<compile_context>
chip_gen: v7x
topology: tpu7x:2x2x1
jax: 0.10.0
libtpu: 0.0.40
codegen_flags: <defaults>
</compile_context>

<pallas_src>
import functools

import numpy as np

import jax
import jax.numpy as jnp
from jax import lax
from jax.experimental import pallas as pl
from jax.experimental.pallas import tpu as pltpu


# ----------------------------------------------------------------------------
# Small helpers
# ----------------------------------------------------------------------------
def _round_up(x, m):
    return ((x + m - 1) // m) * m


def _pick_tile_w(W, cin, cout, max_bytes=1 << 20):
    """Largest divisor Tw of W whose band-block conv weight stays <= max_bytes."""
    best = 1
    for tw in range(1, W + 1):
        if W % tw:
            continue
        if 3 * (tw + 2) * cin * tw * cout * 2 <= max_bytes:
            best = tw
    return best


def _pick_batch_block(N, H, row_bytes, target_rows=128, max_bytes=4 << 20):
    """Images per grid step: fill the MXU M dim (up to ~128 rows) within a VMEM cap."""
    best = 1
    for nb in range(1, N + 1):
        if N % nb:
            continue
        if nb * H <= target_rows and nb * (H + 2) * row_bytes <= max_bytes:
            best = nb
    return best


_VMEM_LIMIT = [None]


def _vmem_limit_bytes():
    """~Half of physical VMEM: 64 MiB on v5e/v6e (128 MiB), 32 MiB on v7x (64 MiB)."""
    if _VMEM_LIMIT[0] is None:
        limit = 32 * 1024 * 1024
        try:
            cap = int(pltpu.get_tpu_info().vmem_capacity_bytes)
            limit = int(min(max(cap // 2, 32 * 1024 * 1024), 96 * 1024 * 1024))
        except Exception:
            pass
        _VMEM_LIMIT[0] = limit
    return _VMEM_LIMIT[0]


def _compiler_params():
    return pltpu.CompilerParams(
        dimension_semantics=("parallel",),
        vmem_limit_bytes=_vmem_limit_bytes(),
    )


# ----------------------------------------------------------------------------
# Host-side constant builders (numpy, run once at setup time)
# ----------------------------------------------------------------------------
def _bilinear_matrix_padded(n_in, n_out):
    """(n_out+2, n_in) align_corners=True bilinear matrix with zero border rows."""
    m = np.zeros((n_out + 2, n_in), np.float32)
    if n_in == 1:
        m[1:n_out + 1, 0] = 1.0
        return m
    s = np.arange(n_out, dtype=np.float64) * (n_in - 1) / (n_out - 1)
    i0 = np.minimum(np.floor(s).astype(np.int64), n_in - 1)
    i1 = np.minimum(i0 + 1, n_in - 1)
    f = (s - i0).astype(np.float32)
    rows = np.arange(n_out) + 1
    np.add.at(m, (rows, i0), 1.0 - f)
    np.add.at(m, (rows, i1), f)
    return m


def _col_upsample_kron(W, C, wo_pad):
    """(W*C, wo_pad) per-channel column upsample; zero border + zero lane-pad cols."""
    a = _bilinear_matrix_padded(W, 2 * W).T.astype(np.float32)    # (W, 2W+2)
    k = np.kron(a, np.eye(C, dtype=np.float32))                   # (W*C, (2W+2)*C)
    out = np.zeros((W * C, wo_pad), np.float32)
    out[:, :k.shape[1]] = k
    return out


def _banded_conv_weights(ws, Tw):
    """Shift-invariant band block of the 3x3 conv (BN scale already folded in ws).

    ws: (Cout, Cin, 3, 3).  Returns B of shape (3, (Tw+2)*Cin, Tw*Cout) so that
    for any output tile starting at pixel t*Tw:
        out[h, (t*Tw+w)*Cout+co] = sum_dy  xpad[h+dy, t*Tw*Cin : (t*Tw+Tw+2)*Cin] @ B[dy]
    """
    cout, cin = ws.shape[0], ws.shape[1]
    b = np.zeros((3, (Tw + 2) * cin, Tw * cout), np.float32)
    for dy in range(3):
        for dx in range(3):
            blk = ws[:, :, dy, dx].T                               # (Cin, Cout)
            for w in range(Tw):
                b[dy, (w + dx) * cin:(w + dx + 1) * cin,
                      w * cout:(w + 1) * cout] = blk
    return b


# ----------------------------------------------------------------------------
# Pallas kernels
# ----------------------------------------------------------------------------
def _conv_rows_banded(x, wb_ref, *, H, W, Tw, cin, Nb):
    """Band-blocked 3x3 conv on lane-dense padded input -> (Nb*H, W*Cout) f32."""
    rows = [x[:, dy:dy + H, :].reshape(Nb * H, x.shape[-1]) for dy in range(3)]
    slab = (Tw + 2) * cin
    parts = []
    for t in range(W // Tw):                 # static loop; lane pad cols never read
        lo = t * Tw * cin
        acc = jnp.dot(rows[0][:, lo:lo + slab], wb_ref[0],
                      preferred_element_type=jnp.float32)
        acc = acc + jnp.dot(rows[1][:, lo:lo + slab], wb_ref[1],
                            preferred_element_type=jnp.float32)
        acc = acc + jnp.dot(rows[2][:, lo:lo + slab], wb_ref[2],
                            preferred_element_type=jnp.float32)
        parts.append(acc)
    return parts[0] if len(parts) == 1 else jnp.concatenate(parts, axis=-1)


def _fused_block_kernel(xp_ref, wb_ref, shift_ref, kmat_ref, rmat_ref, o_ref,
                        *, H, W, Tw, cin, Nb):
    """conv3x3 (+folded BN) + ReLU + 2x bilinear upsample; output pre-padded for
    the next layer's conv (zero border rows/cols + zero lane padding)."""
    x = xp_ref[...]                                               # (Nb, H+2, Win) bf16
    acc = _conv_rows_banded(x, wb_ref, H=H, W=W, Tw=Tw, cin=cin, Nb=Nb)
    y = jnp.maximum(acc + shift_ref[...], 0.0).astype(jnp.bfloat16)   # (Nb*H, W*Cout)
    # Column upsample first (M = Nb*H rows), then per-image row upsample.
    up = jnp.dot(y, kmat_ref[...], preferred_element_type=jnp.float32)  # (Nb*H, Wo)
    for n in range(Nb):
        up_n = up[n * H:(n + 1) * H, :].astype(jnp.bfloat16)
        o_ref[n] = jnp.dot(rmat_ref[...], up_n,
                           preferred_element_type=jnp.float32).astype(o_ref.dtype)


def _final_conv_kernel(xp_ref, wb_ref, shift_ref, o_ref, *, H, W, Tw, cin, cout, Nb):
    """Plain conv3x3 + bias (no BN / ReLU / upsample), unpadded f32 output."""
    x = xp_ref[...]
    acc = _conv_rows_banded(x, wb_ref, H=H, W=W, Tw=Tw, cin=cin, Nb=Nb)
    y = acc + shift_ref[...]
    o_ref[...] = y.reshape(Nb, H, W * cout).astype(o_ref.dtype)


# ----------------------------------------------------------------------------
# pallas_call wrappers
# ----------------------------------------------------------------------------
def fused_decoder_block(xp, wb, shift, kmat, rmat, *, H, W, Tw, cin, Nb):
    N, Hp, Win = xp.shape
    Ho, Wo = 2 * H + 2, kmat.shape[1]
    kernel = functools.partial(_fused_block_kernel, H=H, W=W, Tw=Tw, cin=cin, Nb=Nb)
    return pl.pallas_call(
        kernel,
        out_shape=jax.ShapeDtypeStruct((N, Ho, Wo), jnp.bfloat16),
        grid_spec=pltpu.PrefetchScalarGridSpec(
            num_scalar_prefetch=0,
            grid=(N // Nb,),
            in_specs=[
                pl.BlockSpec((Nb, Hp, Win), lambda n: (n, 0, 0)),     # activations
                pl.BlockSpec(wb.shape, lambda n: (0, 0, 0)),          # conv band block
                pl.BlockSpec(shift.shape, lambda n: (0, 0)),          # folded shift
                pl.BlockSpec(kmat.shape, lambda n: (0, 0)),           # col upsample
                pl.BlockSpec(rmat.shape, lambda n: (0, 0)),           # row upsample
            ],
            out_specs=pl.BlockSpec((Nb, Ho, Wo), lambda n: (n, 0, 0)),
        ),
        compiler_params=_compiler_params(),
    )(xp, wb, shift, kmat, rmat)


def final_conv_block(xp, wb, shift, *, H, W, Tw, cin, cout, Nb):
    N, Hp, Win = xp.shape
    Nd = W * cout
    kernel = functools.partial(_final_conv_kernel, H=H, W=W, Tw=Tw, cin=cin,
                               cout=cout, Nb=Nb)
    return pl.pallas_call(
        kernel,
        out_shape=jax.ShapeDtypeStruct((N, H, Nd), jnp.float32),
        grid_spec=pltpu.PrefetchScalarGridSpec(
            num_scalar_prefetch=0,
            grid=(N // Nb,),
            in_specs=[
                pl.BlockSpec((Nb, Hp, Win), lambda n: (n, 0, 0)),
                pl.BlockSpec(wb.shape, lambda n: (0, 0, 0)),
                pl.BlockSpec(shift.shape, lambda n: (0, 0)),
            ],
            out_specs=pl.BlockSpec((Nb, H, Nd), lambda n: (n, 0, 0)),
        ),
        compiler_params=_compiler_params(),
    )(xp, wb, shift)


# ----------------------------------------------------------------------------
# Parameter construction (deterministic, synthetic) + forward pass
# ----------------------------------------------------------------------------
def init_feature_decoder_constants(key, features, num_classes, H, W):
    """Per-layer kernel constants (eval-mode BatchNorm folded into the conv)."""
    cins = [features[0] * 3, features[1], features[2], features[3], features[4]]
    couts = [features[1], features[2], features[3], features[4], num_classes]
    eps = 1e-5
    layers = []
    h, w = H, W
    win_pad = _round_up((W + 2) * cins[0], 128)      # layer-0 input lane width
    for i, (cin, cout) in enumerate(zip(cins, couts)):
        key, kw_, kb, kg, kbe, km, kv = jax.random.split(key, 7)
        wt = 0.05 * jax.random.normal(kw_, (cout, cin, 3, 3), jnp.float32)
        bias = 0.05 * jax.random.normal(kb, (cout,), jnp.float32)
        if i < 4:   # decoder blocks carry BatchNorm (folded, eval mode)
            gamma = 1.0 + 0.1 * jax.random.normal(kg, (cout,), jnp.float32)
            beta = 0.1 * jax.random.normal(kbe, (cout,), jnp.float32)
            mean = 0.1 * jax.random.normal(km, (cout,), jnp.float32)
            var = 1.0 + jax.random.uniform(kv, (cout,), jnp.float32)
            s = np.asarray(gamma / jnp.sqrt(var + eps), np.float32)
            shift = np.asarray((bias - mean) * s + beta, np.float32)
        else:       # final_out conv: plain bias, no BN / ReLU
            s = np.ones((cout,), np.float32)
            shift = np.asarray(bias, np.float32)

        ws = np.asarray(wt, np.float32) * s[:, None, None, None]   # BN scale folded
        tw = _pick_tile_w(w, cin, cout)
        layer = dict(
            wb=jnp.asarray(_banded_conv_weights(ws, tw), jnp.bfloat16),
            shift=jnp.asarray(np.tile(shift, w)[None, :], jnp.float32),
            w_ref=jnp.asarray(ws, jnp.float32),          # f32 copies for the reference
            shift_vec=jnp.asarray(shift, jnp.float32),
            H=h, W=w, Tw=tw, cin=cin, cout=cout, win_pad=win_pad,
        )
        if i < 4:
            wo_pad = _round_up((2 * w + 2) * cout, 128)  # lane-dense padded output
            layer["kmat"] = jnp.asarray(_col_upsample_kron(w, cout, wo_pad),
                                        jnp.bfloat16)
            layer["rmat"] = jnp.asarray(_bilinear_matrix_padded(h, 2 * h),
                                        jnp.bfloat16)
            win_pad = wo_pad
            h, w = 2 * h, 2 * w
        layers.append(layer)
    return layers


def feature_decoder_forward(x_nchw, layers):
    N, C, H, W = x_nchw.shape
    # NCHW -> lane-dense padded (N, H+2, (W+2)*C) bf16, lane-padded to 128 multiple.
    # This is the only host-side pad; every later layer receives a pre-padded,
    # lane-dense tensor straight from the previous fused kernel.
    x = jnp.transpose(x_nchw, (0, 2, 3, 1)).astype(jnp.bfloat16)
    x = jnp.pad(x, ((0, 0), (1, 1), (1, 1), (0, 0)))
    xp = x.reshape(N, H + 2, (W + 2) * C)
    lane_pad = layers[0]["win_pad"] - xp.shape[-1]
    if lane_pad > 0:
        xp = jnp.pad(xp, ((0, 0), (0, 0), (0, lane_pad)))

    for i in range(4):
        L = layers[i]
        nb = _pick_batch_block(N, L["H"], row_bytes=2 * xp.shape[-1])
        xp = fused_decoder_block(xp, L["wb"], L["shift"], L["kmat"], L["rmat"],
                                 H=L["H"], W=L["W"], Tw=L["Tw"], cin=L["cin"], Nb=nb)

    L = layers[4]
    nb = _pick_batch_block(N, L["H"], row_bytes=2 * xp.shape[-1])
    y = final_conv_block(xp, L["wb"], L["shift"], H=L["H"], W=L["W"], Tw=L["Tw"],
                         cin=L["cin"], cout=L["cout"], Nb=nb)      # (N, H, W*nc) f32
    out = y.reshape(N, L["H"], L["W"], L["cout"])
    return jnp.transpose(out, (0, 3, 1, 2))                        # NHWC -> NCHW


# ----------------------------------------------------------------------------
# Pure-JAX f32 reference of the same (BN-folded) module, for a sanity check
# ----------------------------------------------------------------------------
def _conv3x3_ref(x_nhwc, w_oihw, shift):
    w_hwio = jnp.transpose(w_oihw, (2, 3, 1, 0))
    y = lax.conv_general_dilated(x_nhwc, w_hwio, (1, 1), 'SAME',
                                 dimension_numbers=('NHWC', 'HWIO', 'NHWC'))
    return y + shift[None, None, None, :]


def _upsample2x_ref(x_nhwc):
    N, H, W, C = x_nhwc.shape
    rm = jnp.asarray(_bilinear_matrix_padded(H, 2 * H)[1:-1], jnp.float32)
    cm = jnp.asarray(_bilinear_matrix_padded(W, 2 * W)[1:-1], jnp.float32)
    y = jnp.einsum('ph,nhwc->npwc', rm, x_nhwc)
    y = jnp.einsum('qw,npwc->npqc', cm, y)
    return y


def reference_forward(x_nchw, layers):
    x = jnp.transpose(x_nchw, (0, 2, 3, 1)).astype(jnp.float32)
    for i in range(4):
        L = layers[i]
        x = jnp.maximum(_conv3x3_ref(x, L["w_ref"], L["shift_vec"]), 0.0)
        x = _upsample2x_ref(x)
    L = layers[4]
    x = _conv3x3_ref(x, L["w_ref"], L["shift_vec"])
    return jnp.transpose(x, (0, 3, 1, 2))


if __name__ == "__main__":
    # Small synthetic configuration consistent with the module's structure.
    features = [32, 16, 16, 8, 8]
    num_classes = 2
    B, H, W = 2, 8, 8

    key = jax.random.PRNGKey(0)
    kx, kp = jax.random.split(key)
    x_nchw = jax.random.normal(kx, (B, features[0] * 3, H, W), jnp.float32)

    layers = init_feature_decoder_constants(kp, features, num_classes, H, W)

    out = jax.block_until_ready(feature_decoder_forward(x_nchw, layers))

    assert out.shape == (B, num_classes, H * 16, W * 16), out.shape
    assert out.dtype == jnp.float32
    assert bool(jnp.all(jnp.isfinite(out)))

    # Cross-check the Pallas pipeline against the dense f32 reference of the same
    # folded parameters (generous tolerance: bf16 activations/weights, 5 layers).
    ref = jax.block_until_ready(reference_forward(x_nchw, layers))
    err = float(jnp.max(jnp.abs(out - ref)))
    bound = 0.1 * float(jnp.max(jnp.abs(ref))) + 0.05
    assert err <= bound, (err, bound)

    print("KERNEL_OK")
</pallas_src>

<mosaic_0001>
module attributes {stable_mosaic.version = 11 : i64} {
  func.func @_fused_block_kernel(%arg0: i32, %arg1: memref<2x10x1024xbf16, #tpu.memory_space<vmem>>, %arg2: memref<3x960x128xbf16, #tpu.memory_space<vmem>>, %arg3: memref<1x128xf32, #tpu.memory_space<vmem>>, %arg4: memref<128x384xbf16, #tpu.memory_space<vmem>>, %arg5: memref<18x8xbf16, #tpu.memory_space<vmem>>, %arg6: memref<2x18x384xbf16, #tpu.memory_space<vmem>>) attributes {dimension_semantics = [#tpu.dimension_semantics<parallel>], iteration_bounds = array<i64: 1>, scalar_prefetch = 0 : i64, scratch_operands = 0 : i64, tpu.core_type = #tpu.core_type<tc>, window_params = [{transform_indices = @transform_0, window_bounds = array<i64: 2, 10, 1024>}, {pipeline_mode = #tpu.pipeline_mode<synchronous>, transform_indices = @transform_1, window_bounds = array<i64: 3, 960, 128>}, {pipeline_mode = #tpu.pipeline_mode<synchronous>, transform_indices = @transform_2, window_bounds = array<i64: 1, 128>}, {pipeline_mode = #tpu.pipeline_mode<synchronous>, transform_indices = @transform_3, window_bounds = array<i64: 128, 384>}, {pipeline_mode = #tpu.pipeline_mode<synchronous>, transform_indices = @transform_4, window_bounds = array<i64: 18, 8>}, {transform_indices = @transform_5, window_bounds = array<i64: 2, 18, 384>}]} {
    %c0 = arith.constant 0 : index
    %c0_0 = arith.constant 0 : index
    %c0_1 = arith.constant 0 : index
    %0 = vector.load %arg1[%c0, %c0_0, %c0_1] : memref<2x10x1024xbf16, #tpu.memory_space<vmem>>, vector<2x10x1024xbf16>
    %1 = vector.extract_strided_slice %0 {offsets = [0, 0, 0], sizes = [2, 8, 1024], strides = [1, 1, 1]} : vector<2x10x1024xbf16> to vector<2x8x1024xbf16>
    %2 = vector.shape_cast %1 : vector<2x8x1024xbf16> to vector<16x1024xbf16>
    %3 = vector.extract_strided_slice %0 {offsets = [0, 1, 0], sizes = [2, 8, 1024], strides = [1, 1, 1]} : vector<2x10x1024xbf16> to vector<2x8x1024xbf16>
    %4 = vector.shape_cast %3 : vector<2x8x1024xbf16> to vector<16x1024xbf16>
    %5 = vector.extract_strided_slice %0 {offsets = [0, 2, 0], sizes = [2, 8, 1024], strides = [1, 1, 1]} : vector<2x10x1024xbf16> to vector<2x8x1024xbf16>
    %6 = vector.shape_cast %5 : vector<2x8x1024xbf16> to vector<16x1024xbf16>
    %7 = vector.extract_strided_slice %2 {offsets = [0, 0], sizes = [16, 960], strides = [1, 1]} : vector<16x1024xbf16> to vector<16x960xbf16>
    %c0_2 = arith.constant 0 : index
    %c0_3 = arith.constant 0 : index
    %c0_4 = arith.constant 0 : index
    %8 = vector.load %arg2[%c0_2, %c0_3, %c0_4] : memref<3x960x128xbf16, #tpu.memory_space<vmem>>, vector<1x960x128xbf16>
    %9 = vector.shape_cast %8 : vector<1x960x128xbf16> to vector<960x128xbf16>
    %cst = arith.constant dense<0.000000e+00> : vector<16x128xf32>
    %10 = tpu.matmul %7, %9, %cst {dimension_numbers = #tpu.dot_dimension_numbers<[1], [0], [0], [1], [0, 0, 1, 1], [], []>} : vector<16x960xbf16>, vector<960x128xbf16>, vector<16x128xf32> -> vector<16x128xf32>
    %11 = vector.extract_strided_slice %4 {offsets = [0, 0], sizes = [16, 960], strides = [1, 1]} : vector<16x1024xbf16> to vector<16x960xbf16>
    %c1 = arith.constant 1 : index
    %c0_5 = arith.constant 0 : index
    %c0_6 = arith.constant 0 : index
    %12 = vector.load %arg2[%c1, %c0_5, %c0_6] : memref<3x960x128xbf16, #tpu.memory_space<vmem>>, vector<1x960x128xbf16>
    %13 = vector.shape_cast %12 : vector<1x960x128xbf16> to vector<960x128xbf16>
    %cst_7 = arith.constant dense<0.000000e+00> : vector<16x128xf32>
    %14 = tpu.matmul %11, %13, %cst_7 {dimension_numbers = #tpu.dot_dimension_numbers<[1], [0], [0], [1], [0, 0, 1, 1], [], []>} : vector<16x960xbf16>, vector<960x128xbf16>, vector<16x128xf32> -> vector<16x128xf32>
    %15 = arith.addf %10, %14 : vector<16x128xf32>
    %16 = vector.extract_strided_slice %6 {offsets = [0, 0], sizes = [16, 960], strides = [1, 1]} : vector<16x1024xbf16> to vector<16x960xbf16>
    %c2 = arith.constant 2 : index
    %c0_8 = arith.constant 0 : index
    %c0_9 = arith.constant 0 : index
    %17 = vector.load %arg2[%c2, %c0_8, %c0_9] : memref<3x960x128xbf16, #tpu.memory_space<vmem>>, vector<1x960x128xbf16>
    %18 = vector.shape_cast %17 : vector<1x960x128xbf16> to vector<960x128xbf16>
    %cst_10 = arith.constant dense<0.000000e+00> : vector<16x128xf32>
    %19 = tpu.matmul %16, %18, %cst_10 {dimension_numbers = #tpu.dot_dimension_numbers<[1], [0], [0], [1], [0, 0, 1, 1], [], []>} : vector<16x960xbf16>, vector<960x128xbf16>, vector<16x128xf32> -> vector<16x128xf32>
    %20 = arith.addf %15, %19 : vector<16x128xf32>
    %c0_11 = arith.constant 0 : index
    %c0_12 = arith.constant 0 : index
    %21 = vector.load %arg3[%c0_11, %c0_12] : memref<1x128xf32, #tpu.memory_space<vmem>>, vector<1x128xf32>
    %22 = vector.broadcast %21 : vector<1x128xf32> to vector<16x128xf32>
    %23 = arith.addf %20, %22 : vector<16x128xf32>
    %cst_13 = arith.constant 0.000000e+00 : f32
    %24 = vector.broadcast %cst_13 : f32 to vector<16x128xf32>
    %25 = arith.maximumf %23, %24 : vector<16x128xf32>
    %26 = arith.truncf %25 : vector<16x128xf32> to vector<16x128xbf16>
    %c0_14 = arith.constant 0 : index
    %c0_15 = arith.constant 0 : index
    %27 = vector.load %arg4[%c0_14, %c0_15] : memref<128x384xbf16, #tpu.memory_space<vmem>>, vector<128x384xbf16>
    %cst_16 = arith.constant dense<0.000000e+00> : vector<16x384xf32>
    %28 = tpu.matmul %26, %27, %cst_16 {dimension_numbers = #tpu.dot_dimension_numbers<[1], [0], [0], [1], [0, 0, 1, 1], [], []>} : vector<16x128xbf16>, vector<128x384xbf16>, vector<16x384xf32> -> vector<16x384xf32>
    %29 = vector.extract_strided_slice %28 {offsets = [0, 0], sizes = [8, 384], strides = [1, 1]} : vector<16x384xf32> to vector<8x384xf32>
    %30 = arith.truncf %29 : vector<8x384xf32> to vector<8x384xbf16>
    %c0_17 = arith.constant 0 : index
    %c0_18 = arith.constant 0 : index
    %31 = vector.load %arg5[%c0_17, %c0_18] : memref<18x8xbf16, #tpu.memory_space<vmem>>, vector<18x8xbf16>
    %cst_19 = arith.constant dense<0.000000e+00> : vector<18x384xf32>
    %32 = tpu.matmul %31, %30, %cst_19 {dimension_numbers = #tpu.dot_dimension_numbers<[1], [0], [0], [1], [0, 0, 1, 1], [], []>} : vector<18x8xbf16>, vector<8x384xbf16>, vector<18x384xf32> -> vector<18x384xf32>
    %33 = arith.truncf %32 : vector<18x384xf32> to vector<18x384xbf16>
    %c0_20 = arith.constant 0 : index
    %c0_21 = arith.constant 0 : index
    %c0_22 = arith.constant 0 : index
    %34 = vector.load %arg6[%c0_20, %c0_21, %c0_22] : memref<2x18x384xbf16, #tpu.memory_space<vmem>>, vector<1x18x384xbf16>
    %35 = vector.shape_cast %34 : vector<1x18x384xbf16> to vector<18x384xbf16>
    %36 = vector.shape_cast %33 : vector<18x384xbf16> to vector<1x18x384xbf16>
    tpu.vector_store %arg6[%c0_20, %c0_21, %c0_22], %36 {strides = array<i32>} : memref<2x18x384xbf16, #tpu.memory_space<vmem>>, vector<1x18x384xbf16>,
    %37 = vector.extract_strided_slice %28 {offsets = [8, 0], sizes = [8, 384], strides = [1, 1]} : vector<16x384xf32> to vector<8x384xf32>
    %38 = arith.truncf %37 : vector<8x384xf32> to vector<8x384xbf16>
    %c0_23 = arith.constant 0 : index
    %c0_24 = arith.constant 0 : index
    %39 = vector.load %arg5[%c0_23, %c0_24] : memref<18x8xbf16, #tpu.memory_space<vmem>>, vector<18x8xbf16>
    %cst_25 = arith.constant dense<0.000000e+00> : vector<18x384xf32>
    %40 = tpu.matmul %39, %38, %cst_25 {dimension_numbers = #tpu.dot_dimension_numbers<[1], [0], [0], [1], [0, 0, 1, 1], [], []>} : vector<18x8xbf16>, vector<8x384xbf16>, vector<18x384xf32> -> vector<18x384xf32>
    %41 = arith.truncf %40 : vector<18x384xf32> to vector<18x384xbf16>
    %c1_26 = arith.constant 1 : index
    %c0_27 = arith.constant 0 : index
    %c0_28 = arith.constant 0 : index
    %42 = vector.load %arg6[%c1_26, %c0_27, %c0_28] : memref<2x18x384xbf16, #tpu.memory_space<vmem>>, vector<1x18x384xbf16>
    %43 = vector.shape_cast %42 : vector<1x18x384xbf16> to vector<18x384xbf16>
    %44 = vector.shape_cast %41 : vector<18x384xbf16> to vector<1x18x384xbf16>
    tpu.vector_store %arg6[%c1_26, %c0_27, %c0_28], %44 {strides = array<i32>} : memref<2x18x384xbf16, #tpu.memory_space<vmem>>, vector<1x18x384xbf16>,
    return
  }
  func.func @transform_0(%arg0: i32) -> (i32, i32, i32) {
    %c0_i32 = arith.constant 0 : i32
    %c0_i32_0 = arith.constant 0 : i32
    %c0_i32_1 = arith.constant 0 : i32
    return %arg0, %c0_i32, %c0_i32_0 : i32, i32, i32
  }
  func.func @transform_1(%arg0: i32) -> (i32, i32, i32) {
    %c0_i32 = arith.constant 0 : i32
    %c0_i32_0 = arith.constant 0 : i32
    %c0_i32_1 = arith.constant 0 : i32
    %c0_i32_2 = arith.constant 0 : i32
    return %c0_i32, %c0_i32_0, %c0_i32_1 : i32, i32, i32
  }
  func.func @transform_2(%arg0: i32) -> (i32, i32) {
    %c0_i32 = arith.constant 0 : i32
    %c0_i32_0 = arith.constant 0 : i32
    %c0_i32_1 = arith.constant 0 : i32
    return %c0_i32, %c0_i32_0 : i32, i32
  }
  func.func @transform_3(%arg0: i32) -> (i32, i32) {
    %c0_i32 = arith.constant 0 : i32
    %c0_i32_0 = arith.constant 0 : i32
    %c0_i32_1 = arith.constant 0 : i32
    return %c0_i32, %c0_i32_0 : i32, i32
  }
  func.func @transform_4(%arg0: i32) -> (i32, i32) {
    %c0_i32 = arith.constant 0 : i32
    %c0_i32_0 = arith.constant 0 : i32
    %c0_i32_1 = arith.constant 0 : i32
    return %c0_i32, %c0_i32_0 : i32, i32
  }
  func.func @transform_5(%arg0: i32) -> (i32, i32, i32) {
    %c0_i32 = arith.constant 0 : i32
    %c0_i32_0 = arith.constant 0 : i32
    %c0_i32_1 = arith.constant 0 : i32
    return %arg0, %c0_i32, %c0_i32_0 : i32, i32, i32
  }
}

</mosaic_0001>

<bundles_post_ra>
// kernel: tpu_custom_call.1
= control target key start
LH: loop header
LB: loop body
LE: loop exit
PB: predicated region body
PF: predicated region fallthrough
CT: control target
= control target key end

     0   :  { %10 = vsyncpa [#allocation3], 0  ;;  %s3631_s18 = smov [#allocation2]   ;;  %s4119_s0 = inlined_call_operand.vmem [shape: bf16[2,10,1024], index: 0, kind: input, shape index: {}]   ;;  %s4120_s1 = inlined_call_operand.hbm [shape: bf16[3,960,128], index: 1, kind: input, shape index: {}]   ;;  %s4121_s2 = inlined_call_operand.vmem [shape: f32[1,128], index: 2, kind: input, shape index: {}]   ;;  %s4122_s3 = inlined_call_operand.vmem [shape: bf16[128,384], index: 3, kind: input, shape index: {}]   ;;  %s4123_s4 = inlined_call_operand.vmem [shape: bf16[18,8], index: 4, kind: input, shape index: {}]   ;;  %s4124_s5 = inlined_call_operand.vmem [shape: bf16[2,18,384], index: 5, kind: output, shape index: {}]  }
   0x1   :  { %s18_s19 = sshll.u32 %s3631_s18, 4  ;;  %s3607_s22 = scalar_lea.hbm %s4120_s1, 23040  ;;  %s19_s19 = int_to_ptr.vmem [resolvable:$true] %s18_s19 }
   0x2   :  { %p3608_p0 = scmp.ne.s32.totalorder %s4120_s1, %s3607_s22  ;;  %p3611_p1 = scmp.lt.u32.totalorder %s3607_s22, %s4120_s1 }
   0x4   :  { %p3613_p2 = pnand %p3611_p1, %p3608_p0 }
   0x6   :  { %3616 = shalt.err (!%p3613_p2)
}
   0x7   :  { %s3617_s27 = scalar_lea.vmem %s19_s19, 23040  ;;  %p3622_p4 = scmp.lt.s32.totalorder %s19_s19, %s19_s19 }
   0x8   :  { %p3618_p3 = scmp.ne.s32.totalorder %s19_s19, %s3617_s27  ;;  %p3623_p5 = scmp.lt.s32.totalorder %s3617_s27, %s3617_s27 }
   0xa   :  { %p3624_p6 = por %p3623_p5, %p3622_p4 }
   0xc   :  { %p3625_p7 = pnand %p3624_p6, %p3618_p3 }
   0xe   :  { %3628 = shalt.err (!%p3625_p7)
}
   0xf   :  { %s3632_s28 = smov 64   ;;  %s3633_s29 = smov 4  }
  0x10   :  { %24 = dma.hbm_to_vmem [thread:$0]  %s4120_s1, 23040, %s19_s19, [#allocation3], %s3632_s28, %s3632_s28, %s3633_s29  }
  0x11   :  { %3629 = dma.done.wait [#allocation3], 23040  }
  0x12   :  { %3630 = vsyncadd [#allocation3], 4294944256  ;;  %v3391_v0 = vld [vmem:[#allocation2 + $0x220] sm:$0xff]   ;;  %v3395_v4 = vld [vmem:[#allocation2 + $0x228] sm:$0xff]   ;;  %vm51_vm0 = vsmask.f32 3328 }
  0x13   :  { %v3392_v1 = vld [vmem:[#allocation2 + $0x2a0] sm:$0xff]   ;;  %3138 = vmatprep.subr.bf16.mxu0 %v3391_v0  ;;  %v3396_v5 = vld [vmem:[#allocation2 + $0x2a8] sm:$0xff]   ;;  %v3399_v8 = vld [vmem:[#allocation2 + $0x230] sm:$0xff]   ;;  %vm52_vm1 = vsmask.f32 7440  ;;  %v3634_v44 = vmov 0  }
  0x14   :  { %v3393_v2 = vld [vmem:[#allocation2 + $0x1e0] sm:$0xff]   ;;  %3160 = vmatprep.subr.bf16.mxu1 %v3392_v1  ;;  %v3397_v6 = vld [vmem:[#allocation2 + $0x1e8] sm:$0xff]   ;;  %v3400_v9 = vld [vmem:[#allocation2 + $0x2b0] sm:$0xff]   ;;  %vm182_vm3 = vcmask 1042432   ;;  %vm183_vm4 = vcmask 1046532   ;;  %vm849_vm6 = vcmask 523264  }
  0x15   :  { %v3394_v3 = vld [vmem:[#allocation2 + $0x260] sm:$0xff]   ;;  %3139 = vmatpush3.bf16.msra.mxu0 %v3393_v2  ;;  %v3398_v7 = vld [vmem:[#allocation2 + $0x268] sm:$0xff]   ;;  %v3401_v10 = vld [vmem:[#allocation2 + $0x1f0] sm:$0xff]   ;;  %vm3636_vm7 = vmmov 0   ;;  %vm2533_vm8 = vcmask 1043456   ;;  %vm2526_vm9 = vcmask 64512  }
  0x16   :  { %3161 = vmatpush3.bf16.msra.mxu1 %v3394_v3  ;;  %3140 = vmatprep.subr.bf16.mxu0 %v3395_v4  ;;  %v3402_v11 = vld [vmem:[#allocation2 + $0x270] sm:$0xff]   ;;  %v3403_v12 = vld [vmem:[#allocation2 + $0x238] sm:$0xff]   ;;  %v3407_v16 = vld [vmem:[#allocation2 + $0x240] sm:$0xff]  }
  0x17   :  { %3162 = vmatprep.subr.bf16.mxu1 %v3396_v5  ;;  %v3404_v13 = vld [vmem:[#allocation2 + $0x2b8] sm:$0xff]   ;;  %v3408_v17 = vld [vmem:[#allocation2 + $0x2c0] sm:$0xff]   ;;  %v3411_v20 = vld [vmem:[#allocation2 + $0x248] sm:$0xff]  }
  0x18   :  { %v3405_v14 = vld [vmem:[#allocation2 + $0x1f8] sm:$0xff]   ;;  %v3409_v18 = vld [vmem:[#allocation2 + $0x200] sm:$0xff]   ;;  %v3412_v21 = vld [vmem:[#allocation2 + $0x2c8] sm:$0xff]  }
  0x19   :  { %3141 = vmatpush3.bf16.msra.mxu0 %v3397_v6  ;;  %v3406_v15 = vld [vmem:[#allocation2 + $0x278] sm:$0xff]   ;;  %v3410_v19 = vld [vmem:[#allocation2 + $0x280] sm:$0xff]   ;;  %v3413_v22 = vld [vmem:[#allocation2 + $0x208] sm:$0xff]  }
  0x1a   :  { %3163 = vmatpush3.bf16.msra.mxu1 %v3398_v7  ;;  %3142 = vmatprep.subr.bf16.mxu0 %v3399_v8  ;;  %v3414_v23 = vld [vmem:[#allocation2 + $0x288] sm:$0xff]   ;;  %v3415_v24 = vld [vmem:[#allocation2 + $0x250] sm:$0xff]   ;;  %v3419_v28 = vld [vmem:[#allocation2 + $0x258] sm:$0xff]  }
  0x1b   :  { %3164 = vmatprep.subr.bf16.mxu1 %v3400_v9  ;;  %v3416_v25 = vld [vmem:[#allocation2 + $0x2d0] sm:$0xff]   ;;  %v3420_v29 = vld [vmem:[#allocation2 + $0x2d8] sm:$0xff]   ;;  %v3682_v32 = vld [vmem:[%s4119_s0] sm:$0xff] }
  0x1c   :  { %v3417_v26 = vld [vmem:[#allocation2 + $0x210] sm:$0xff]   ;;  %v3421_v30 = vld [vmem:[#allocation2 + $0x218] sm:$0xff]   ;;  %v3687_v33 = vld [vmem:[%s4119_s0 + $0x20] sm:$0x11]  ;;  %v55_v36 = vshrl.u32 %v3682_v32, 16  ;;  %v58_v37 = vshll.u32 %v3682_v32, 16 }
  0x1d   :  { %3143 = vmatpush3.bf16.msra.mxu0 %v3401_v10  ;;  %v3418_v27 = vld [vmem:[#allocation2 + $0x290] sm:$0xff]   ;;  %v3422_v31 = vld [vmem:[#allocation2 + $0x298] sm:$0xff]   ;;  %v3692_v34 = vld [vmem:[%s4119_s0 + $0x40] sm:$0xff]  ;;  %v64_v38 = vshll.u32 %v3687_v33, 16 }
  0x1e   :  { %3165 = vmatpush3.bf16.msra.mxu1 %v3402_v11  ;;  %3144 = vmatprep.subr.bf16.mxu0 %v3403_v12  ;;  %v3697_v35 = vld [vmem:[%s4119_s0 + $0x60] sm:$0x11]  ;;  %v111_v39 = vshrl.u32 %v3692_v34, 16  ;;  %v114_v40 = vshll.u32 %v3692_v34, 16  ;;  %v3708_v42 = vld [vmem:[%s4119_s0 + $0x8] sm:$0xff]  ;;  %v57_v45 = vrot.slane %v55_v36, 4  ;;  %vm3733_vm2 = vmor %vm51_vm0, %vm52_vm1 }
  0x1f   :  { %3166 = vmatprep.subr.bf16.mxu1 %v3404_v13  ;;  %v120_v41 = vshll.u32 %v3697_v35, 16  ;;  %v3713_v43 = vld [vmem:[%s4119_s0 + $0x48] sm:$0xff]  ;;  %v60_v46 = vrot.slane %v58_v37, 5  ;;  %v66_v47 = vrot.slane %v64_v38, 5  ;;  %v69_v53 = vshrl.u32 %v3708_v42, 16  ;;  %v3423_v59 = vld [vmem:[#allocation2 + $0x320] sm:$0xff]   ;;  %vm3785_vm5 = vmor %vm182_vm3, %vm183_vm4 }
  0x20   :  { %v113_v48 = vrot.slane %v111_v39, 4  ;;  %v3719_v49 = vld [vmem:[%s4119_s0 + $0x28] sm:$0x11]  ;;  %v116_v50 = vrot.slane %v114_v40, 5  ;;  %v72_v54 = vshll.u32 %v3708_v42, 16  ;;  %v125_v57 = vshrl.u32 %v3713_v43, 16 }
  0x21   :  { %3145 = vmatpush3.bf16.msra.mxu0 %v3405_v14  ;;  %v122_v51 = vrot.slane %v120_v41, 5  ;;  %v3724_v52 = vld [vmem:[%s4119_s0 + $0x68] sm:$0x11]  ;;  %v61_v55 = vor.u32 %v60_v46, %v57_v45  ;;  %v78_v56 = vshll.u32 %v3719_v49, 16  ;;  %v128_v58 = vshll.u32 %v3713_v43, 16  ;;  %v3424_v12 = vld [vmem:[#allocation2 + $0x2e0] sm:$0xff]  }
  0x22   :  { %3167 = vmatpush3.bf16.msra.mxu1 %v3406_v15  ;;  %3146 = vmatprep.subr.bf16.mxu0 %v3407_v16  ;;  %v117_v61 = vor.u32 %v116_v50, %v113_v48  ;;  %v71_v62 = vrot.slane %v69_v53, 4  ;;  %v74_v63 = vrot.slane %v72_v54, 5  ;;  %v134_v0 = vshll.u32 %v3724_v52, 16  ;;  %v3434_v37 = vld [vmem:[#allocation2 + $0x378] sm:$0xff]   ;;  %v3436_v39 = vld [vmem:[#allocation2 + $0x300] sm:$0xff]   ;;  %v3438_v41 = vld [vmem:[#allocation2 + $0x348] sm:$0xff]  }
  0x23   :  { %3168 = vmatprep.subr.bf16.mxu1 %v3408_v17  ;;  %v62_v1 = vrot.slane %v61_v55, 4  ;;  %v127_v2 = vrot.slane %v125_v57, 4  ;;  %v130_v3 = vrot.slane %v128_v58, 5  ;;  %v80_v6 = vrot.slane %v78_v56, 5  ;;  %v3426_v17 = vld [vmem:[#allocation2 + $0x328] sm:$0xff]   ;;  %v3437_v40 = vld [vmem:[#allocation2 + $0x380] sm:$0xff]  }
  0x24   :  { %v118_v4 = vrot.slane %v117_v61, 4  ;;  %v75_v5 = vor.u32 %v74_v63, %v71_v62  ;;  %v136_v9 = vrot.slane %v134_v0, 5  ;;  %v2931_v13 = vcombine.low %v3682_v32, %v3692_v34  ;;  %v3439_v45 = vld [vmem:[#allocation2 + $0x308] sm:$0xff]   ;;  %v3441_v46 = vld [vmem:[#allocation2 + $0x350] sm:$0xff]   ;;  %v3460_v60 = vld [vmem:[#allocation2 + $0xc0] sm:$0xff]  }
  0x25   :  { %3147 = vmatpush3.bf16.msra.mxu0 %v3409_v18  ;;  %v67_v7 = vsel %vm3733_vm2, %v62_v1, %v66_v47  ;;  %v131_v8 = vor.u32 %v130_v3, %v127_v2  ;;  %v2933_v18 = vcombine.low %v3708_v42, %v3713_v43  ;;  %v187_v36 = vrot.slane %v3687_v33, 5  ;;  %v3758_v33 = vld [vmem:[%s4119_s0 + $0x10] sm:$0xff]  ;;  %v3444_v1 = vld [vmem:[#allocation2 + $0x358] sm:$0xff]  }
  0x26   :  { %3169 = vmatpush3.bf16.msra.mxu1 %v3410_v19  ;;  %3148 = vmatprep.subr.bf16.mxu0 %v3411_v20  ;;  %v123_v10 = vsel %vm3733_vm2, %v118_v4, %v122_v51  ;;  %v76_v11 = vrot.slane %v75_v5, 4  ;;  %v203_v38 = vrot.slane %v3697_v35, 5  ;;  %v2854_v47 = vrot.slane %v3682_v32, 9  ;;  %v3766_v48 = vld [vmem:[%s4119_s0 + $0x30] sm:$0x11] }
  0x27   :  { %3170 = vmatprep.subr.bf16.mxu1 %v3412_v21  ;;  %v2862_v14 = vcombine.low %v67_v7, %v123_v10  ;;  %v2863_v15 = vcombine.high %v67_v7, %v123_v10  ;;  %v132_v16 = vrot.slane %v131_v8, 4  ;;  %v2858_v35 = vrot.slane %v3692_v34, 9  ;;  %v3771_v50 = vld [vmem:[%s4119_s0 + $0x50] sm:$0xff] }
  0x28   :  { %v81_v19 = vsel %vm3733_vm2, %v76_v11, %v80_v6  ;;  %v3776_v51 = vld [vmem:[%s4119_s0 + $0x70] sm:$0x11]  ;;  %v83_v53 = vshrl.u32 %v3758_v33, 16  ;;  %v86_v54 = vshll.u32 %v3758_v33, 16  ;;  %v92_v55 = vshll.u32 %v3766_v48, 16 }
  0x29   :  { %3149 = vmatpush3.bf16.msra.mxu0 %v3413_v22  ;;  %885 = vmatprep.mubr.bf16.mxu0 %v2863_v15  ;;  %v137_v20 = vsel %vm3733_vm2, %v132_v16, %v136_v9  ;;  %v139_v56 = vshrl.u32 %v3771_v50, 16  ;;  %v142_v57 = vshll.u32 %v3771_v50, 16  ;;  %v3442_v61 = vld [vmem:[#allocation2 + $0x310] sm:$0xff]   ;;  %v148_v63 = vshll.u32 %v3776_v51, 16  ;;  %v3445_v15 = vld [vmem:[#allocation2 + $0x318] sm:$0xff]  }
  0x2a   :  { %3171 = vmatpush3.bf16.msra.mxu1 %v3414_v23  ;;  %3150 = vmatprep.subr.bf16.mxu0 %v3415_v24  ;;  %v2864_v21 = vcombine.low %v81_v19, %v137_v20  ;;  %v2865_v22 = vcombine.high %v81_v19, %v137_v20  ;;  %v3425_v23 = vld [vmem:[#allocation2 + $0x360] sm:$0xff]   ;;  %v3427_v24 = vld [vmem:[#allocation2 + $0x2e8] sm:$0xff]   ;;  %v85_v62 = vrot.slane %v83_v53, 4  ;;  %v2935_v0 = vcombine.low %v3758_v33, %v3771_v50  ;;  %v3498_v58 = vld [vmem:[#allocation2 + $0x130] sm:$0xff]  }
  0x2b   :  { %3172 = vmatprep.subr.bf16.mxu1 %v3416_v25  ;;  %v3429_v25 = vld [vmem:[#allocation2 + $0x330] sm:$0xff]   ;;  %v88_v2 = vrot.slane %v86_v54, 5  ;;  %v141_v3 = vrot.slane %v139_v56, 4  ;;  %v144_v4 = vrot.slane %v142_v57, 5  ;;  %v94_v5 = vrot.slane %v92_v55, 5  ;;  %v3451_v56 = vld [vmem:[#allocation2 + $0x3a8] sm:$0xff]  }
  0x2c   :  { %926 = vmatprep.mubr.bf16.mxu1 %v2865_v22  ;;  %v150_v6 = vrot.slane %v148_v63, 5  ;;  %v3795_v7 = vsel %vm3785_vm5, %v2854_v47, %v187_v36  ;;  %v3799_v8 = vsel %vm3785_vm5, %v2858_v35, %v203_v38  ;;  %v191_v22 = vrot.slane %v3719_v49, 5  ;;  %v3825_v36 = vld [vmem:[%s4119_s0 + $0x38] sm:$0x11]  ;;  %v3453_v57 = vld [vmem:[#allocation2 + $0x50] sm:$0xff]  }
  0x2d   :  { %3151 = vmatpush3.bf16.msra.mxu0 %v3417_v26  ;;  %v3428_v26 = vld [vmem:[#allocation2 + $0x368] sm:$0xff]   ;;  %v89_v9 = vor.u32 %v88_v2, %v85_v62  ;;  %v145_v10 = vor.u32 %v144_v4, %v141_v3  ;;  %v3000_v11 = vcombine.low %v3795_v7, %v3799_v8  ;;  %v2859_v49 = vrot.slane %v3713_v43, 9  ;;  %v3455_v63 = vld [vmem:[#allocation2 + $0x10] sm:$0xff]  }
  0x2e   :  { %3173 = vmatpush3.bf16.msra.mxu1 %v3418_v27  ;;  %3152 = vmatprep.subr.bf16.mxu0 %v3419_v28  ;;  %v3430_v27 = vld [vmem:[#allocation2 + $0x2f0] sm:$0xff]   ;;  %v3432_v28 = vld [vmem:[#allocation2 + $0x338] sm:$0xff]   ;;  %v2856_v38 = vrot.slane %v3758_v33, 9  ;;  %v106_v47 = vshll.u32 %v3825_v36, 16 }
  0x2f   :  { %3174 = vmatprep.subr.bf16.mxu1 %v3420_v29  ;;  %v3431_v29 = vld [vmem:[#allocation2 + $0x370] sm:$0xff]   ;;  %v90_v16 = vrot.slane %v89_v9, 4 }
  0x31   :  { %3153 = vmatpush3.bf16.msra.mxu0 %v3421_v30  ;;  %v3433_v30 = vld [vmem:[#allocation2 + $0x2f8] sm:$0xff]   ;;  %v95_v19 = vsel %vm3733_vm2, %v90_v16, %v94_v5 }
  0x32   :  { %3175 = vmatpush3.bf16.msra.mxu1 %v3422_v31  ;;  %3182 = vmatprep.subr.bf16.mxu0 %v3423_v59  ;;  %v3435_v31 = vld [vmem:[#allocation2 + $0x340] sm:$0xff]   ;;  %v3440_v59 = vld [vmem:[#allocation2 + $0x388] sm:$0xff]  }
  0x33   :  { %976 = vmatprep.subr.bf16.mxu1 %v3634_v44 }
  0x34   :  { %886 = vmatmul.mubr.bf16.vlgmr.msra.gmra.mrb[0].mxu0 %v2862_v14  ;;  %v3443_v14 = vld [vmem:[#allocation2 + $0x390] sm:$0xff]  }
  0x35   :  { %3183 = vmatpush3.bf16.msra.mxu0 %v3424_v12  ;;  %927 = vmatmul.mubr.bf16.vlgmr.msra.gmra.mrb[0].mxu1 %v2864_v21  ;;  %v3001_v12 = vcombine.high %v3795_v7, %v3799_v8  ;;  %v3447_v21 = vld [vmem:[#allocation2 + $0x40] sm:$0xff]   ;;  %v3537_v7 = vld [vmem:[#allocation2 + $0x510] sm:$0xff]   ;;  %v3539_v8 = vld [vmem:[#allocation2 + $0x498] sm:$0xff]  }
  0x36   :  { %3184 = vmatprep.subr.bf16.mxu0 %v3426_v17  ;;  %977 = vmatpush1.bf16.msra.mxu1 %v3425_v23  ;;  %v146_v17 = vrot.slane %v145_v10, 4  ;;  %v3456_v10 = vld [vmem:[#allocation2 + $0x58] sm:$0xff]  }
  0x37   :  { %978 = vmatprep.subr.bf16.mxu1 %v3634_v44 }
  0x38   :  { %v151_v20 = vsel %vm3733_vm2, %v146_v17, %v150_v6  ;;  %v2860_v17 = vrot.slane %v3771_v50, 9 }
  0x39   :  { %3185 = vmatpush3.bf16.msra.mxu0 %v3427_v24  ;;  %v2867_v23 = vcombine.high %v95_v19, %v151_v20  ;;  %v207_v24 = vrot.slane %v3724_v52, 5  ;;  %v3820_v52 = vld [vmem:[%s4119_s0 + $0x18] sm:$0xff] }
  0x3a   :  { %3186 = vmatprep.subr.bf16.mxu0 %v3429_v25  ;;  %979 = vmatpush1.bf16.msra.mxu1 %v3428_v26  ;;  %v3446_v25 = vld [vmem:[#allocation2 + $0x398] sm:$0xff]   ;;  %v2866_v26 = vcombine.low %v95_v19, %v151_v20  ;;  %v3454_v20 = vld [vmem:[#allocation2 + $0x3b0] sm:$0xff]  }
  0x3b   :  { %980 = vmatprep.subr.bf16.mxu1 %v3634_v44  ;;  %967 = vmatprep.mubr.bf16.mxu0 %v2867_v23  ;;  %v3848_v35 = vsel %vm3785_vm5, %v2859_v49, %v207_v24  ;;  %v3458_v23 = vld [vmem:[#allocation2 + $0x18] sm:$0xff]   ;;  %v3463_v49 = vld [vmem:[#allocation2 + $0x68] sm:$0xff]  }
  0x3d   :  { %3187 = vmatpush3.bf16.msra.mxu0 %v3430_v27  ;;  %v3449_v27 = vld [vmem:[#allocation2] sm:$0xff]  }
  0x3e   :  { %3188 = vmatprep.subr.bf16.mxu0 %v3432_v28  ;;  %981 = vmatpush1.bf16.msra.mxu1 %v3431_v29  ;;  %v2855_v28 = vrot.slane %v3708_v42, 9  ;;  %v3450_v29 = vld [vmem:[#allocation2 + $0x48] sm:$0xff]  }
  0x3f   :  { %982 = vmatprep.subr.bf16.mxu1 %v3634_v44 }
  0x41   :  { %3189 = vmatpush3.bf16.msra.mxu0 %v3433_v30  ;;  %v2932_v30 = vcombine.high %v3682_v32, %v3692_v34  ;;  %v3490_v32 = vld [vmem:[#allocation2 + $0x118] sm:$0xff]   ;;  %v3491_v34 = vld [vmem:[#allocation2 + $0x160] sm:$0xff]  }
  0x42   :  { %3190 = vmatprep.subr.bf16.mxu0 %v3435_v31  ;;  %983 = vmatpush1.bf16.msra.mxu1 %v3434_v37  ;;  %v3448_v31 = vld [vmem:[#allocation2 + $0x3a0] sm:$0xff]   ;;  %v3829_v37 = vsel %vm3785_vm5, %v2855_v28, %v191_v22  ;;  %v211_v22 = vrot.slane %v3776_v51, 5  ;;  %v3457_v28 = vld [vmem:[#allocation2 + $0x3b8] sm:$0xff]  }
  0x43   :  { %984 = vmatprep.subr.bf16.mxu1 %v3634_v44  ;;  %v3002_v4 = vcombine.low %v3829_v37, %v3848_v35  ;;  %v3003_v6 = vcombine.high %v3829_v37, %v3848_v35  ;;  %v3562_v37 = vld [vmem:[#allocation2 + $0x558] sm:$0xff]   ;;  %v3563_v35 = vld [vmem:[#allocation2 + $0x560] sm:$0xff]  }
  0x45   :  { %3191 = vmatpush3.bf16.msra.mxu0 %v3436_v39  ;;  %v195_v39 = vrot.slane %v3766_v48, 5  ;;  %v3452_v48 = vld [vmem:[#allocation2 + $0x8] sm:$0xff]  }
  0x46   :  { %3192 = vmatprep.subr.bf16.mxu0 %v3438_v41  ;;  %985 = vmatpush1.bf16.msra.mxu1 %v3437_v40  ;;  %v3836_v40 = vld [vmem:[%s4119_s0 + $0x58] sm:$0xff] }
  0x47   :  { %986 = vmatprep.subr.bf16.mxu1 %v3634_v44  ;;  %v3841_v41 = vld [vmem:[%s4119_s0 + $0x78] sm:$0x11]  ;;  %v153_v53 = vshrl.u32 %v3836_v40, 16  ;;  %v156_v54 = vshll.u32 %v3836_v40, 16  ;;  %v2937_v62 = vcombine.low %v3820_v52, %v3836_v40  ;;  %v3862_v9 = vsel %vm3785_vm5, %v2856_v38, %v195_v39  ;;  %v3462_v38 = vld [vmem:[#allocation2 + $0x80] sm:$0xff]   ;;  %v3464_v39 = vld [vmem:[#allocation2 + $0xc8] sm:$0xff]  }
  0x48   :  { %v162_v55 = vshll.u32 %v3841_v41, 16 }
  0x49   :  { %3193 = vmatpush3.bf16.msra.mxu0 %v3439_v45  ;;  %v97_v45 = vshrl.u32 %v3820_v52, 16  ;;  %v155_v2 = vrot.slane %v153_v53, 4  ;;  %v158_v3 = vrot.slane %v156_v54, 5  ;;  %v3468_v53 = vld [vmem:[#allocation2 + $0xd0] sm:$0xff]  }
  0x4a   :  { %3194 = vmatprep.subr.bf16.mxu0 %v3441_v46  ;;  %987 = vmatpush1.bf16.msra.mxu1 %v3440_v59  ;;  %v100_v46 = vshll.u32 %v3820_v52, 16  ;;  %v3469_v54 = vld [vmem:[#allocation2 + $0x30] sm:$0xff]  }
  0x4b   :  { %988 = vmatprep.subr.bf16.mxu1 %v3634_v44  ;;  %v99_v59 = vrot.slane %v97_v45, 4  ;;  %v2934_v45 = vcombine.high %v3708_v42, %v3713_v43  ;;  %v3501_v42 = vld [vmem:[#allocation2 + $0x138] sm:$0xff]   ;;  %v3503_v43 = vld [vmem:[#allocation2 + $0x400] sm:$0xff]  }
  0x4d   :  { %3195 = vmatpush3.bf16.msra.mxu0 %v3442_v61  ;;  %v102_v61 = vrot.slane %v100_v46, 5  ;;  %v3465_v46 = vld [vmem:[#allocation2 + $0x28] sm:$0xff]  }
  0x4e   :  { %3196 = vmatprep.subr.bf16.mxu0 %v3444_v1  ;;  %989 = vmatpush1.bf16.msra.mxu1 %v3443_v14  ;;  %v108_v1 = vrot.slane %v106_v47, 5  ;;  %v159_v14 = vor.u32 %v158_v3, %v155_v2  ;;  %v3467_v47 = vld [vmem:[#allocation2 + $0x70] sm:$0xff]   ;;  %v3478_v2 = vld [vmem:[#allocation2 + $0x100] sm:$0xff]   ;;  %v3480_v3 = vld [vmem:[#allocation2 + $0x148] sm:$0xff]  }
  0x4f   :  { %990 = vmatprep.subr.bf16.mxu1 %v3634_v44  ;;  %v103_v5 = vor.u32 %v102_v61, %v99_v59  ;;  %v3473_v59 = vld [vmem:[#allocation2 + $0x38] sm:$0xff]   ;;  %v3476_v61 = vld [vmem:[#allocation2 + $0x140] sm:$0xff]  }
  0x50   :  { %v160_v19 = vrot.slane %v159_v14, 4  ;;  %v3479_v14 = vld [vmem:[#allocation2 + $0xe8] sm:$0xff]  }
  0x51   :  { %3197 = vmatpush3.bf16.msra.mxu0 %v3445_v15  ;;  %v164_v15 = vrot.slane %v162_v55, 5  ;;  %v104_v16 = vrot.slane %v103_v5, 4  ;;  %v3471_v55 = vld [vmem:[#allocation2 + $0x78] sm:$0xff]   ;;  %v2936_v5 = vcombine.high %v3758_v33, %v3771_v50  ;;  %v3510_v50 = vld [vmem:[#allocation2 + $0x1b0] sm:$0xff]  }
  0x52   :  { %3204 = vmatprep.subr.bf16.mxu0 %v3447_v21  ;;  %991 = vmatpush1.bf16.msra.mxu1 %v3446_v25  ;;  %v3512_v33 = vld [vmem:[#allocation2 + $0x418] sm:$0xff]  }
  0x53   :  { %992 = vmatprep.subr.bf16.mxu1 %v3634_v44  ;;  %v109_v21 = vsel %vm3733_vm2, %v104_v16, %v108_v1  ;;  %v165_v24 = vsel %vm3733_vm2, %v160_v19, %v164_v15  ;;  %v3475_v1 = vld [vmem:[#allocation2 + $0xe0] sm:$0xff]   ;;  %v3482_v15 = vld [vmem:[#allocation2 + $0x108] sm:$0xff]   ;;  %v3484_v16 = vld [vmem:[#allocation2 + $0x150] sm:$0xff]  }
  0x54   :  { %968 = vmatmul.mubr.bf16.vlgmr.msra.gmra.mrb[4].mxu0 %v2866_v26  ;;  %v2869_v25 = vcombine.high %v109_v21, %v165_v24  ;;  %v3459_v26 = vld [vmem:[#allocation2 + $0x60] sm:$0xff]   ;;  %v3483_v19 = vld [vmem:[#allocation2 + $0xf0] sm:$0xff]  }
  0x55   :  { %3205 = vmatpush3.bf16.msra.mxu0 %v3449_v27  ;;  %1443 = vmatprep.mubr.bf16.mxu0 %v2932_v30  ;;  %v3874_v27 = vsel %vm3785_vm5, %v2860_v17, %v211_v22  ;;  %v3461_v30 = vld [vmem:[#allocation2 + $0x20] sm:$0xff]   ;;  %v3481_v17 = vld [vmem:[#allocation2 + $0xa8] sm:$0xff]   ;;  %v3485_v22 = vld [vmem:[#allocation2 + $0xb0] sm:$0xff]  }
  0x56   :  { %3206 = vmatprep.subr.bf16.mxu0 %v3450_v29  ;;  %993 = vmatpush1.bf16.msra.mxu1 %v3448_v31  ;;  %v3004_v29 = vcombine.low %v3862_v9, %v3874_v27  ;;  %v3005_v51 = vcombine.high %v3862_v9, %v3874_v27  ;;  %v2868_v31 = vcombine.low %v109_v21, %v165_v24  ;;  %v3488_v21 = vld [vmem:[#allocation2 + $0x158] sm:$0xff]   ;;  %v3492_v24 = vld [vmem:[#allocation2 + $0x120] sm:$0xff]   ;;  %v3565_v9 = vld [vmem:[#allocation2 + $0x570] sm:$0xff]  }
  0x57   :  { %994 = vmatprep.subr.bf16.mxu1 %v3634_v44  ;;  %2930 = vmatprep.mubr.msk.bf16.mxu1 %vm849_vm6, %v2869_v25  ;;  %v2857_v25 = vrot.slane %v3820_v52, 9  ;;  %v3566_v27 = vld [vmem:[#allocation2 + $0x578] sm:$0xff]  }
  0x59   :  { %3207 = vmatpush3.bf16.msra.mxu0 %v3452_v48  ;;  %v3466_v48 = vld [vmem:[#allocation2 + $0x88] sm:$0xff]  }
  0x5a   :  { %3208 = vmatprep.subr.bf16.mxu0 %v3453_v57  ;;  %995 = vmatpush1.bf16.msra.mxu1 %v3451_v56  ;;  %v3470_v56 = vld [vmem:[#allocation2 + $0x90] sm:$0xff]   ;;  %v3472_v57 = vld [vmem:[#allocation2 + $0xd8] sm:$0xff]  }
  0x5b   :  { %996 = vmatprep.subr.bf16.mxu1 %v3634_v44 }
  0x5d   :  { %3209 = vmatpush3.bf16.msra.mxu0 %v3455_v63  ;;  %v3474_v63 = vld [vmem:[#allocation2 + $0x98] sm:$0xff]  }
  0x5e   :  { %3210 = vmatprep.subr.bf16.mxu0 %v3456_v10  ;;  %997 = vmatpush1.bf16.msra.mxu1 %v3454_v20  ;;  %v3477_v10 = vld [vmem:[#allocation2 + $0xa0] sm:$0xff]   ;;  %v3486_v20 = vld [vmem:[#allocation2 + $0x110] sm:$0xff]  }
  0x5f   :  { %998 = vmatprep.subr.bf16.mxu1 %v3634_v44 }
  0x61   :  { %3211 = vmatpush3.bf16.msra.mxu0 %v3458_v23  ;;  %v3487_v23 = vld [vmem:[#allocation2 + $0xf8] sm:$0xff]  }
  0x62   :  { %3212 = vmatprep.subr.bf16.mxu0 %v3459_v26  ;;  %999 = vmatpush1.bf16.msra.mxu1 %v3457_v28  ;;  %v3494_v26 = vld [vmem:[#allocation2 + $0x168] sm:$0xff]   ;;  %v199_v28 = vrot.slane %v3825_v36, 5 }
  0x63   :  { %3226 = vmatprep.subr.bf16.mxu1 %v3460_v60  ;;  %v2861_v60 = vrot.slane %v3836_v40, 9 }
  0x65   :  { %3213 = vmatpush3.bf16.msra.mxu0 %v3461_v30  ;;  %1009 = vmatmul.mubr.bf16.vlgmr.msra.gmra.mrb[4].mxu1 %v2868_v31  ;;  %v3493_v30 = vld [vmem:[#allocation2 + $0x180] sm:$0xff]   ;;  %v3896_v31 = vsel %vm3785_vm5, %v2857_v25, %v199_v28  ;;  %v3533_v25 = vld [vmem:[#allocation2 + $0x508] sm:$0xff]  }
  0x66   :  { %3214 = vmatprep.subr.bf16.mxu0 %v3463_v49  ;;  %3227 = vmatpush3.bf16.msra.mxu1 %v3462_v38  ;;  %v2938_v49 = vcombine.high %v3820_v52, %v3836_v40  ;;  %v215_v38 = vrot.slane %v3841_v41, 5  ;;  %v3534_v28 = vld [vmem:[#allocation2 + $0x4c8] sm:$0xff]   ;;  %v3543_v52 = vld [vmem:[#allocation2 + $0x4a0] sm:$0xff]   ;;  %v3542_v40 = vld [vmem:[#allocation2 + $0x4d8] sm:$0xff]  }
  0x67   :  { %1484 = vmatprep.mubr.bf16.mxu1 %v2934_v45  ;;  %3228 = vmatprep.subr.bf16.mxu1 %v3464_v39  ;;  %v3495_v39 = vld [vmem:[#allocation2 + $0x128] sm:$0xff]   ;;  %v3497_v45 = vld [vmem:[#allocation2 + $0x170] sm:$0xff]  }
  0x68   :  { %v3902_v36 = vsel %vm3785_vm5, %v2861_v60, %v215_v38  ;;  %v3536_v60 = vld [vmem:[#allocation2 + $0x450] sm:$0xff]   ;;  %v3547_v38 = vld [vmem:[#allocation2 + $0x4a8] sm:$0xff]  }
  0x69   :  { %3215 = vmatpush3.bf16.msra.mxu0 %v3465_v46  ;;  %v3007_v46 = vcombine.high %v3896_v31, %v3902_v36  ;;  %v3006_v41 = vcombine.low %v3896_v31, %v3902_v36 }
  0x6a   :  { %3216 = vmatprep.subr.bf16.mxu0 %v3467_v47  ;;  %3229 = vmatpush3.bf16.msra.mxu1 %v3466_v48  ;;  %v3496_v47 = vld [vmem:[#allocation2 + $0x188] sm:$0xff]   ;;  %v3500_v48 = vld [vmem:[#allocation2 + $0x178] sm:$0xff]  }
  0x6b   :  { %3230 = vmatprep.subr.bf16.mxu1 %v3468_v53  ;;  %v3499_v53 = vld [vmem:[#allocation2 + $0x190] sm:$0xff]  }
  0x6d   :  { %3217 = vmatpush3.bf16.msra.mxu0 %v3469_v54  ;;  %v3505_v54 = vld [vmem:[#allocation2 + $0x3c0] sm:$0xff]  }
  0x6e   :  { %3218 = vmatprep.subr.bf16.mxu0 %v3471_v55  ;;  %3231 = vmatpush3.bf16.msra.mxu1 %v3470_v56  ;;  %v3506_v55 = vld [vmem:[#allocation2 + $0x408] sm:$0xff]   ;;  %v3504_v56 = vld [vmem:[#allocation2 + $0x1a0] sm:$0xff]  }
  0x6f   :  { %3232 = vmatprep.subr.bf16.mxu1 %v3472_v57  ;;  %v3508_v57 = vld [vmem:[#allocation2 + $0x3c8] sm:$0xff]  }
  0x71   :  { %3219 = vmatpush3.bf16.msra.mxu0 %v3473_v59  ;;  %v3509_v59 = vld [vmem:[#allocation2 + $0x410] sm:$0xff]  }
  0x72   :  { %3248 = vmatprep.subr.bf16.mxu0 %v3476_v61  ;;  %3233 = vmatpush3.bf16.msra.mxu1 %v3474_v63  ;;  %v3507_v61 = vld [vmem:[#allocation2 + $0x1a8] sm:$0xff]   ;;  %v3511_v63 = vld [vmem:[#allocation2 + $0x3d0] sm:$0xff]  }
  0x73   :  { %3234 = vmatprep.subr.bf16.mxu1 %v3475_v1  ;;  %v3515_v1 = vld [vmem:[#allocation2 + $0x420] sm:$0xff]  }
  0x74   :  { %1444 = vmatmul.mubr.bf16.vlgmr.msra.gmra.mrb[8].mxu0 %v2931_v13  ;;  %v3489_v13 = vld [vmem:[#allocation2 + $0xb8] sm:$0xff]  }
  0x75   :  { %3249 = vmatpush3.bf16.msra.mxu0 %v3478_v2  ;;  %1525 = vmatprep.mubr.bf16.mxu0 %v2936_v5  ;;  %v3513_v2 = vld [vmem:[#allocation2 + $0x1b8] sm:$0xff]   ;;  %v3516_v5 = vld [vmem:[#allocation2 + $0x1c0] sm:$0xff]  }
  0x76   :  { %3250 = vmatprep.subr.bf16.mxu0 %v3480_v3  ;;  %3235 = vmatpush3.bf16.msra.mxu1 %v3477_v10  ;;  %v3518_v3 = vld [vmem:[#allocation2 + $0x428] sm:$0xff]  }
  0x77   :  { %3236 = vmatprep.subr.bf16.mxu1 %v3479_v14  ;;  %v3520_v10 = vld [vmem:[#allocation2 + $0x3e8] sm:$0xff]   ;;  %v3521_v14 = vld [vmem:[#allocation2 + $0x430] sm:$0xff]  }
  0x79   :  { %3251 = vmatpush3.bf16.msra.mxu0 %v3482_v15  ;;  %v3519_v15 = vld [vmem:[#allocation2 + $0x1c8] sm:$0xff]  }
  0x7a   :  { %3252 = vmatprep.subr.bf16.mxu0 %v3484_v16  ;;  %3237 = vmatpush3.bf16.msra.mxu1 %v3481_v17  ;;  %v3523_v16 = vld [vmem:[#allocation2 + $0x3f0] sm:$0xff]   ;;  %v3524_v17 = vld [vmem:[#allocation2 + $0x438] sm:$0xff]  }
  0x7b   :  { %3238 = vmatprep.subr.bf16.mxu1 %v3483_v19  ;;  %v3522_v19 = vld [vmem:[#allocation2 + $0x1d0] sm:$0xff]  }
  0x7d   :  { %3253 = vmatpush3.bf16.msra.mxu0 %v3486_v20  ;;  %v3526_v20 = vld [vmem:[#allocation2 + $0x3f8] sm:$0xff]  }
  0x7e   :  { %3254 = vmatprep.subr.bf16.mxu0 %v3488_v21  ;;  %3239 = vmatpush3.bf16.msra.mxu1 %v3485_v22  ;;  %v3527_v21 = vld [vmem:[#allocation2 + $0x480] sm:$0xff]   ;;  %v3525_v22 = vld [vmem:[#allocation2 + $0x1d8] sm:$0xff]  }
  0x7f   :  { %3240 = vmatprep.subr.bf16.mxu1 %v3487_v23  ;;  %v3528_v23 = vld [vmem:[#allocation2 + $0x440] sm:$0xff]  }
  0x81   :  { %3255 = vmatpush3.bf16.msra.mxu0 %v3490_v32  ;;  %v3529_v32 = vld [vmem:[#allocation2 + $0x500] sm:$0xff]  }
  0x82   :  { %3256 = vmatprep.subr.bf16.mxu0 %v3491_v34  ;;  %3241 = vmatpush3.bf16.msra.mxu1 %v3489_v13  ;;  %v3531_v34 = vld [vmem:[#allocation2 + $0x488] sm:$0xff]   ;;  %v3530_v13 = vld [vmem:[#allocation2 + $0x4c0] sm:$0xff]  }
  0x83   :  { %1534 = vmatprep.subr.bf16.mxu1 %v3634_v44 }
  0x85   :  { %3257 = vmatpush3.bf16.msra.mxu0 %v3492_v24  ;;  %1485 = vmatmul.mubr.bf16.vlgmr.msra.gmra.mrb[8].mxu1 %v2933_v18  ;;  %v3502_v18 = vld [vmem:[#allocation2 + $0x198] sm:$0xff]   ;;  %v3532_v24 = vld [vmem:[#allocation2 + $0x448] sm:$0xff]  }
  0x86   :  { %3258 = vmatprep.subr.bf16.mxu0 %v3494_v26  ;;  %1535 = vmatpush1.bf16.msra.mxu1 %v3493_v30  ;;  %v3535_v26 = vld [vmem:[#allocation2 + $0x490] sm:$0xff]   ;;  %v3540_v30 = vld [vmem:[#allocation2 + $0x458] sm:$0xff]  }
  0x87   :  { %2999 = vmatprep.mubr.msk.bf16.mxu1 %vm849_vm6, %v2938_v49  ;;  %1536 = vmatprep.subr.bf16.mxu1 %v3634_v44  ;;  %v3545_v49 = vld [vmem:[#allocation2 + $0x520] sm:$0xff]  }
  0x89   :  { %3259 = vmatpush3.bf16.msra.mxu0 %v3495_v39  ;;  %v3548_v39 = vld [vmem:[#allocation2 + $0x468] sm:$0xff]  }
  0x8a   :  { %3260 = vmatprep.subr.bf16.mxu0 %v3497_v45  ;;  %1537 = vmatpush1.bf16.msra.mxu1 %v3496_v47  ;;  %v3549_v45 = vld [vmem:[#allocation2 + $0x528] sm:$0xff]   ;;  %v3551_v47 = vld [vmem:[#allocation2 + $0x4b0] sm:$0xff]  }
  0x8b   :  { %1538 = vmatprep.subr.bf16.mxu1 %v3634_v44 }
  0x8d   :  { %3261 = vmatpush3.bf16.msra.mxu0 %v3498_v58  ;;  %v3550_v58 = vld [vmem:[#allocation2 + $0x4e8] sm:$0xff]  }
  0x8e   :  { %3262 = vmatprep.subr.bf16.mxu0 %v3500_v48  ;;  %1539 = vmatpush1.bf16.msra.mxu1 %v3499_v53  ;;  %v3552_v48 = vld [vmem:[#allocation2 + $0x470] sm:$0xff]  }
  0x8f   :  { %1540 = vmatprep.subr.bf16.mxu1 %v3634_v44  ;;  %v3553_v53 = vld [vmem:[#allocation2 + $0x530] sm:$0xff]  }
  0x91   :  { %3263 = vmatpush3.bf16.msra.mxu0 %v3501_v42  ;;  %v3555_v42 = vld [vmem:[#allocation2 + $0x4b8] sm:$0xff]  }
  0x92   :  { %3270 = vmatprep.subr.bf16.mxu0 %v3503_v43  ;;  %1541 = vmatpush1.bf16.msra.mxu1 %v3502_v18  ;;  %v3554_v43 = vld [vmem:[#allocation2 + $0x4f0] sm:$0xff]   ;;  %v3556_v18 = vld [vmem:[#allocation2 + $0x478] sm:$0xff]  }
  0x93   :  { %1542 = vmatprep.subr.bf16.mxu1 %v3634_v44 }
  0x94   :  { %1526 = vmatmul.mubr.bf16.vlgmr.msra.gmra.mrb[12].mxu0 %v2935_v0  ;;  %v3514_v0 = vld [vmem:[#allocation2 + $0x3d8] sm:$0xff]  }
  0x95   :  { %3271 = vmatpush3.bf16.msra.mxu0 %v3505_v54  ;;  %2122 = vmatprep.mubr.bf16.mxu0 %v3001_v12  ;;  %v3517_v12 = vld [vmem:[#allocation2 + $0x3e0] sm:$0xff]   ;;  %v3557_v54 = vld [vmem:[#allocation2 + $0x538] sm:$0xff]  }
  0x96   :  { %3272 = vmatprep.subr.bf16.mxu0 %v3506_v55  ;;  %1543 = vmatpush1.bf16.msra.mxu1 %v3504_v56  ;;  %v3558_v55 = vld [vmem:[#allocation2 + $0x4f8] sm:$0xff]   ;;  %v3559_v56 = vld [vmem:[#allocation2 + $0x540] sm:$0xff]  }
  0x97   :  { %1544 = vmatprep.subr.bf16.mxu1 %v3634_v44 }
  0x99   :  { %3273 = vmatpush3.bf16.msra.mxu0 %v3508_v57  ;;  %v3560_v57 = vld [vmem:[#allocation2 + $0x548] sm:$0xff]  }
  0x9a   :  { %3274 = vmatprep.subr.bf16.mxu0 %v3509_v59  ;;  %1545 = vmatpush1.bf16.msra.mxu1 %v3507_v61  ;;  %v3561_v59 = vld [vmem:[#allocation2 + $0x550] sm:$0xff]  }
  0x9b   :  { %1546 = vmatprep.subr.bf16.mxu1 %v3634_v44  ;;  %v3569_v61 = vld [vmem:[#allocation2 + $0x590] sm:$0xff]  }
  0x9d   :  { %3275 = vmatpush3.bf16.msra.mxu0 %v3511_v63  ;;  %v3570_v63 = vld [vmem:[#allocation2 + $0x598] sm:$0xff]  }
  0x9e   :  { %3276 = vmatprep.subr.bf16.mxu0 %v3512_v33  ;;  %1547 = vmatpush1.bf16.msra.mxu1 %v3510_v50 }
  0x9f   :  { %1548 = vmatprep.subr.bf16.mxu1 %v3634_v44 }
  0xa1   :  { %3277 = vmatpush3.bf16.msra.mxu0 %v3514_v0 }
  0xa2   :  { %3278 = vmatprep.subr.bf16.mxu0 %v3515_v1  ;;  %1549 = vmatpush1.bf16.msra.mxu1 %v3513_v2 }
  0xa3   :  { %1550 = vmatprep.subr.bf16.mxu1 %v3634_v44 }
  0xa5   :  { %3279 = vmatpush3.bf16.msra.mxu0 %v3517_v12 }
  0xa6   :  { %3280 = vmatprep.subr.bf16.mxu0 %v3518_v3  ;;  %1551 = vmatpush1.bf16.msra.mxu1 %v3516_v5 }
  0xa7   :  { %1552 = vmatprep.subr.bf16.mxu1 %v3634_v44 }
  0xa9   :  { %3281 = vmatpush3.bf16.msra.mxu0 %v3520_v10 }
  0xaa   :  { %3282 = vmatprep.subr.bf16.mxu0 %v3521_v14  ;;  %1553 = vmatpush1.bf16.msra.mxu1 %v3519_v15 }
  0xab   :  { %1554 = vmatprep.subr.bf16.mxu1 %v3634_v44 }
  0xad   :  { %3283 = vmatpush3.bf16.msra.mxu0 %v3523_v16 }
  0xae   :  { %3284 = vmatprep.subr.bf16.mxu0 %v3524_v17  ;;  %1555 = vmatpush1.bf16.msra.mxu1 %v3522_v19 }
  0xaf   :  { %1556 = vmatprep.subr.bf16.mxu1 %v3634_v44 }
  0xb1   :  { %3285 = vmatpush3.bf16.msra.mxu0 %v3526_v20 }
  0xb2   :  { %3292 = vmatprep.subr.bf16.mxu0 %v3527_v21  ;;  %1557 = vmatpush1.bf16.msra.mxu1 %v3525_v22 }
  0xb3   :  { %3314 = vmatprep.subr.bf16.mxu1 %v3529_v32 }
  0xb4   :  { %2123 = vmatmul.mubr.bf16.vlgmr.msra.gmra.mrb[16].mxu0 %v3000_v11  ;;  %v3538_v11 = vld [vmem:[#allocation2 + $0x4d0] sm:$0xff]  }
  0xb5   :  { %3293 = vmatpush3.bf16.msra.mxu0 %v3528_v23  ;;  %2163 = vmatprep.mubr.bf16.mxu0 %v3003_v6  ;;  %v3541_v6 = vld [vmem:[#allocation2 + $0x518] sm:$0xff]  }
  0xb6   :  { %3294 = vmatprep.subr.bf16.mxu0 %v3531_v34  ;;  %1567 = vmatmul.mubr.bf16.vlgmr.msra.gmra.mrb[12].mxu1 %v2937_v62  ;;  %v3544_v62 = vld [vmem:[#allocation2 + $0x460] sm:$0xff]  }
  0xb7   :  { %3315 = vmatpush3.bf16.msra.mxu1 %v3530_v13  ;;  %2204 = vmatprep.mubr.bf16.mxu1 %v3005_v51  ;;  %v3546_v51 = vld [vmem:[#allocation2 + $0x4e0] sm:$0xff]  }
  0xb8   :  { %3316 = vmatprep.subr.bf16.mxu1 %v3533_v25  ;;  %v3571_v34 = vld [vmem:[%s4122_s3] ss:$12 sps:$4 sm:$0xff]   ;;  %v3573_v13 = vld [vmem:[%s4122_s3 + $0x4] ss:$12 sps:$4 sm:$0xff]  }
  0xb9   :  { %3295 = vmatpush3.bf16.msra.mxu0 %v3532_v24  ;;  %v3576_v24 = vld [vmem:[%s4122_s3 + $0x1c] ss:$12 sps:$4 sm:$0xff]   ;;  %v3574_v25 = vld [vmem:[%s4122_s3 + $0x18] ss:$12 sps:$4 sm:$0xff]  }
  0xba   :  { %3296 = vmatprep.subr.bf16.mxu0 %v3535_v26  ;;  %v3579_v26 = vld [vmem:[%s4122_s3 + $0x34] ss:$12 sps:$4 sm:$0xff]  }
  0xbb   :  { %3317 = vmatpush3.bf16.msra.mxu1 %v3534_v28  ;;  %v3577_v28 = vld [vmem:[%s4122_s3 + $0x30] ss:$12 sps:$4 sm:$0xff]  }
  0xbc   :  { %3318 = vmatprep.subr.bf16.mxu1 %v3537_v7  ;;  %v3580_v7 = vld [vmem:[%s4122_s3 + $0x48] ss:$12 sps:$4 sm:$0xff]  }
  0xbd   :  { %3297 = vmatpush3.bf16.msra.mxu0 %v3536_v60  ;;  %v3582_v60 = vld [vmem:[%s4122_s3 + $0x4c] ss:$12 sps:$4 sm:$0xff]  }
  0xbe   :  { %3298 = vmatprep.subr.bf16.mxu0 %v3539_v8 }
  0xbf   :  { %3319 = vmatpush3.bf16.msra.mxu1 %v3538_v11  ;;  %v3585_v11 = vld [vmem:[%s4122_s3 + $0x64] ss:$12 sps:$4 sm:$0xff]  }
  0xc0   :  { %3320 = vmatprep.subr.bf16.mxu1 %v3541_v6 }
  0xc1   :  { %3299 = vmatpush3.bf16.msra.mxu0 %v3540_v30 }
  0xc2   :  { %3300 = vmatprep.subr.bf16.mxu0 %v3543_v52 }
  0xc3   :  { %3321 = vmatpush3.bf16.msra.mxu1 %v3542_v40 }
  0xc4   :  { %3322 = vmatprep.subr.bf16.mxu1 %v3545_v49  ;;  %v3583_v49 = vld [vmem:[%s4122_s3 + $0x60] ss:$12 sps:$4 sm:$0xff]  }
  0xc5   :  { %3301 = vmatpush3.bf16.msra.mxu0 %v3544_v62 }
  0xc6   :  { %3302 = vmatprep.subr.bf16.mxu0 %v3547_v38 }
  0xc7   :  { %3323 = vmatpush3.bf16.msra.mxu1 %v3546_v51 }
  0xc8   :  { %3324 = vmatprep.subr.bf16.mxu1 %v3549_v45 }
  0xc9   :  { %3303 = vmatpush3.bf16.msra.mxu0 %v3548_v39 }
  0xca   :  { %3304 = vmatprep.subr.bf16.mxu0 %v3551_v47 }
  0xcb   :  { %3325 = vmatpush3.bf16.msra.mxu1 %v3550_v58 }
  0xcc   :  { %3326 = vmatprep.subr.bf16.mxu1 %v3553_v53 }
  0xcd   :  { %3305 = vmatpush3.bf16.msra.mxu0 %v3552_v48 }
  0xce   :  { %3306 = vmatprep.subr.bf16.mxu0 %v3555_v42  ;;  %v3588_v42 = vld [vmem:[%s4122_s3 + $0x7c] ss:$12 sps:$4 sm:$0xff]  }
  0xcf   :  { %3327 = vmatpush3.bf16.msra.mxu1 %v3554_v43  ;;  %v3586_v43 = vld [vmem:[%s4122_s3 + $0x78] ss:$12 sps:$4 sm:$0xff]  }
  0xd0   :  { %3328 = vmatprep.subr.bf16.mxu1 %v3557_v54 }
  0xd1   :  { %3307 = vmatpush3.bf16.msra.mxu0 %v3556_v18 }
  0xd2   :  { %2213 = vmatprep.subr.bf16.mxu0 %v3634_v44 }
  0xd3   :  { %3329 = vmatpush3.bf16.msra.mxu1 %v3558_v55 }
  0xd4   :  { %2164 = vmatmul.mubr.bf16.vlgmr.msra.gmra.mrb[20].mxu0 %v3002_v4  ;;  %v3564_v4 = vld [vmem:[#allocation2 + $0x568] sm:$0xff]   ;;  %2428 = vmatprep.subr.bf16.mxu1 %v3573_v13 }
  0xd5   :  { %2214 = vmatpush1.bf16.msra.mxu0 %v3559_v56  ;;  %3068 = vmatprep.mubr.msk.bf16.mxu0 %vm849_vm6, %v3007_v46  ;;  %v3568_v46 = vld [vmem:[#allocation2 + $0x588] sm:$0xff]  }
  0xd6   :  { %2215 = vmatprep.subr.bf16.mxu0 %v3634_v44  ;;  %2205 = vmatmul.mubr.bf16.vlgmr.msra.gmra.mrb[16].mxu1 %v3004_v29  ;;  %v3567_v29 = vld [vmem:[#allocation2 + $0x580] sm:$0xff]  }
  0xd7   :  { %2460 = vmatprep.mubr.bf16.mxu1 %v3634_v44  ;;  %2429 = vmatpush1.bf16.msra.mxu1 %v3571_v34 }
  0xd8   :  { %2430 = vmatprep.subr.bf16.mxu1 %v3576_v24 }
  0xd9   :  { %2216 = vmatpush1.bf16.msra.mxu0 %v3560_v57  ;;  %v3591_v57 = vld [vmem:[%s4122_s3 + $0x94] ss:$12 sps:$4 sm:$0xff]  }
  0xda   :  { %2217 = vmatprep.subr.bf16.mxu0 %v3634_v44 }
  0xdb   :  { %2431 = vmatpush1.bf16.msra.mxu1 %v3574_v25 }
  0xdc   :  { %2432 = vmatprep.subr.bf16.mxu1 %v3579_v26 }
  0xdd   :  { %2218 = vmatpush1.bf16.msra.mxu0 %v3561_v59 }
  0xde   :  { %2219 = vmatprep.subr.bf16.mxu0 %v3634_v44 }
  0xdf   :  { %2433 = vmatpush1.bf16.msra.mxu1 %v3577_v28 }
  0xe0   :  { %2434 = vmatprep.subr.bf16.mxu1 %v3582_v60 }
  0xe1   :  { %2220 = vmatpush1.bf16.msra.mxu0 %v3562_v37  ;;  %v3589_v37 = vld [vmem:[%s4122_s3 + $0x90] ss:$12 sps:$4 sm:$0xff]  }
  0xe2   :  { %2221 = vmatprep.subr.bf16.mxu0 %v3634_v44 }
  0xe3   :  { %2435 = vmatpush1.bf16.msra.mxu1 %v3580_v7 }
  0xe4   :  { %2436 = vmatprep.subr.bf16.mxu1 %v3585_v11 }
  0xe5   :  { %2222 = vmatpush1.bf16.msra.mxu0 %v3563_v35 }
  0xe6   :  { %2223 = vmatprep.subr.bf16.mxu0 %v3634_v44 }
  0xe7   :  { %2437 = vmatpush1.bf16.msra.mxu1 %v3583_v49  ;;  %v3069_v49 = vld [vmem:[%s4121_s2] ss:$0 sm:$0xff] }
  0xe8   :  { %2438 = vmatprep.subr.bf16.mxu1 %v3588_v42 }
  0xe9   :  { %2224 = vmatpush1.bf16.msra.mxu0 %v3564_v4 }
  0xea   :  { %2225 = vmatprep.subr.bf16.mxu0 %v3634_v44 }
  0xeb   :  { %2439 = vmatpush1.bf16.msra.mxu1 %v3586_v43  ;;  %v3595_v43 = vld [vmem:[%s4122_s3 + $0x8] ss:$12 sps:$4 sm:$0xff]  }
  0xec   :  { %2440 = vmatprep.subr.bf16.mxu1 %v3591_v57  ;;  %v3599_v57 = vld [vmem:[%s4122_s3 + $0x68] ss:$12 sps:$4 sm:$0xff]  }
  0xed   :  { %2226 = vmatpush1.bf16.msra.mxu0 %v3565_v9 }
  0xee   :  { %2227 = vmatprep.subr.bf16.mxu0 %v3634_v44 }
  0xef   :  { %2441 = vmatpush1.bf16.msra.mxu1 %v3589_v37  ;;  %v3601_v37 = vld [vmem:[%s4122_s3 + $0x98] ss:$12 sps:$4 sm:$0xff]  }
  0xf1   :  { %2228 = vmatpush1.bf16.msra.mxu0 %v3566_v27  ;;  %v3594_v27 = vld [vmem:[%s4122_s3 + $0xac] ss:$12 sps:$4 sm:$0xff]  }
  0xf2   :  { %2229 = vmatprep.subr.bf16.mxu0 %v3634_v44  ;;  %2442 = vmatprep.subr.bf16.mxu1 %v3594_v27 }
  0xf5   :  { %2230 = vmatpush1.bf16.msra.mxu0 %v3567_v29  ;;  %v3592_v29 = vld [vmem:[%s4122_s3 + $0xa8] ss:$12 sps:$4 sm:$0xff]  }
  0xf6   :  { %2231 = vmatprep.subr.bf16.mxu0 %v3634_v44  ;;  %2443 = vmatpush1.bf16.msra.mxu1 %v3592_v29 }
  0xf9   :  { %2232 = vmatpush1.bf16.msra.mxu0 %v3568_v46  ;;  %v3635_v46 = vmov 0.0  }
  0xfa   :  { %2233 = vmatprep.subr.bf16.mxu0 %v3634_v44  ;;  %3351 = vmatprep.subr.bf16.mxu1 %v3635_v46 }
  0xfd   :  { %2234 = vmatpush1.bf16.msra.mxu0 %v3569_v61 }
  0xfe   :  { %2235 = vmatprep.subr.bf16.mxu0 %v3634_v44 }
 0x101   :  { %2236 = vmatpush1.bf16.msra.mxu0 %v3570_v63 }
 0x104   :  { %2246 = vmatmul.mubr.bf16.vlgmr.msra.gmra.mrb[24].mxu0 %v3006_v41 }
 0x105   :  { %2575 = vmatprep.mubr.bf16.mxu0 %v3634_v44 }
 0x107   :  { %v3154_v33 = vpop.f32.mrb[0].mxu0 }
 0x108   :  { %v3155_v50 = vpop.f32.mrb[1].mxu0  ;;  %v3176_v2 = vpop.f32.mrb[0].mxu1 }
 0x109   :  { %v3156_v0 = vadd.f32 %v3155_v50, %v3154_v33  ;;  %v3157_v1 = vpop.f32.mrb[2].mxu0  ;;  %v3177_v3 = vpop.f32.mrb[1].mxu1 }
 0x10a   :  { %v3158_v12 = vpop.f32.mrb[3].mxu0  ;;  %v3178_v10 = vadd.f32 %v3177_v3, %v3176_v2  ;;  %v3179_v14 = vpop.f32.mrb[2].mxu1 }
 0x10b   :  { %v3159_v5 = vadd.f32 %v3158_v12, %v3157_v1  ;;  %v3180_v15 = vpop.f32.mrb[3].mxu1 }
 0x10c   :  { %v929_v16 = vadd.f32 %v3178_v10, %v3156_v0  ;;  %v3181_v17 = vadd.f32 %v3180_v15, %v3179_v14 }
 0x10e   :  { %v932_v19 = vadd.f32 %v3181_v17, %v3159_v5 }
 0x127   :  { %v3198_v20 = vpop.f32.mrb[4].mxu0 }
 0x128   :  { %v3199_v21 = vpop.f32.mrb[5].mxu0 }
 0x129   :  { %v3200_v31 = vadd.f32 %v3199_v21, %v3198_v20  ;;  %v3201_v36 = vpop.f32.mrb[6].mxu0 }
 0x12a   :  { %v3202_v41 = vpop.f32.mrb[7].mxu0 }
 0x12b   :  { %v3203_v22 = vadd.f32 %v3202_v41, %v3201_v36  ;;  %v970_v23 = vadd.f32 %v3200_v31, %v929_v16 }
 0x12d   :  { %v973_v32 = vadd.f32 %v3203_v22, %v932_v19 }
 0x138   :  { %v1010_v8 = vpop.f32.mrb[4].mxu1 }
 0x139   :  { %v1011_v30 = vadd.f32 %v1010_v8, %v970_v23  ;;  %v1012_v6 = vpop.f32.mrb[5].mxu1 }
 0x13a   :  { %v1013_v52 = vpop.f32.mrb[6].mxu1 }
 0x13b   :  { %v1014_v40 = vadd.f32 %v1013_v52, %v973_v32  ;;  %v1015_v62 = vpop.f32.mrb[7].mxu1 }
 0x147   :  { %v3220_v51 = vpop.f32.mrb[8].mxu0 }
 0x148   :  { %v3221_v38 = vpop.f32.mrb[9].mxu0 }
 0x149   :  { %v3222_v39 = vadd.f32 %v3221_v38, %v3220_v51  ;;  %v3223_v45 = vpop.f32.mrb[10].mxu0 }
 0x14a   :  { %v3224_v47 = vpop.f32.mrb[11].mxu0 }
 0x14b   :  { %v1446_v58 = vadd.f32 %v3222_v39, %v1011_v30  ;;  %v3225_v48 = vadd.f32 %v3224_v47, %v3223_v45 }
 0x14d   :  { %v1449_v53 = vadd.f32 %v3225_v48, %v1014_v40 }
 0x158   :  { %v3242_v18 = vpop.f32.mrb[8].mxu1 }
 0x159   :  { %v3243_v54 = vpop.f32.mrb[9].mxu1 }
 0x15a   :  { %v3244_v55 = vadd.f32 %v3243_v54, %v3242_v18  ;;  %v3245_v56 = vpop.f32.mrb[10].mxu1  ;;  %v3596_v54 = vld [vmem:[%s4122_s3 + $0x20] ss:$12 sps:$4 sm:$0xff]  }
 0x15b   :  { %v3246_v59 = vpop.f32.mrb[11].mxu1 }
 0x15c   :  { %v1487_v35 = vadd.f32 %v3244_v55, %v1446_v58  ;;  %v3247_v4 = vadd.f32 %v3246_v59, %v3245_v56  ;;  %v3597_v55 = vld [vmem:[%s4122_s3 + $0x38] ss:$12 sps:$4 sm:$0xff]   ;;  %v3598_v56 = vld [vmem:[%s4122_s3 + $0x50] ss:$12 sps:$4 sm:$0xff]   ;;  %v3600_v59 = vld [vmem:[%s4122_s3 + $0x80] ss:$12 sps:$4 sm:$0xff]  }
 0x15e   :  { %v1490_v9 = vadd.f32 %v3247_v4, %v1449_v53 }
 0x167   :  { %v3264_v61 = vpop.f32.mrb[12].mxu0 }
 0x168   :  { %v3265_v63 = vpop.f32.mrb[13].mxu0 }
 0x169   :  { %v3266_v33 = vadd.f32 %v3265_v63, %v3264_v61  ;;  %v3267_v50 = vpop.f32.mrb[14].mxu0 }
 0x16a   :  { %v3268_v0 = vpop.f32.mrb[15].mxu0 }
 0x16b   :  { %v3269_v1 = vadd.f32 %v3268_v0, %v3267_v50  ;;  %v1528_v2 = vadd.f32 %v3266_v33, %v1487_v35  ;;  %v3602_v35 = vld [vmem:[%s4122_s3 + $0xb0] ss:$12 sps:$4 sm:$0xff]  }
 0x16d   :  { %v1531_v12 = vadd.f32 %v3269_v1, %v1490_v9 }
 0x187   :  { %v3286_v3 = vpop.f32.mrb[16].mxu0 }
 0x188   :  { %v3287_v5 = vpop.f32.mrb[17].mxu0 }
 0x189   :  { %v3288_v10 = vadd.f32 %v3287_v5, %v3286_v3  ;;  %v3289_v14 = vpop.f32.mrb[18].mxu0  ;;  %v1568_v15 = vpop.f32.mrb[12].mxu1  ;;  %v3606_v3 = vld [vmem:[%s4123_s4 + $0x8] ss:$0 sps:$4 sm:$0x11]  }
 0x18a   :  { %v3290_v16 = vpop.f32.mrb[19].mxu0  ;;  %v1569_v17 = vadd.f32 %v1568_v15, %v1528_v2  ;;  %v1570_v19 = vpop.f32.mrb[13].mxu1  ;;  %v3605_v2 = vld [vmem:[%s4123_s4] sm:$0xff]  }
 0x18b   :  { %v3291_v20 = vadd.f32 %v3290_v16, %v3289_v14  ;;  %v1571_v21 = vpop.f32.mrb[14].mxu1 }
 0x18c   :  { %v1572_v31 = vadd.f32 %v1571_v21, %v1531_v12  ;;  %v1573_v36 = vpop.f32.mrb[15].mxu1  ;;  %v3604_v12 = vld [vmem:[%s4123_s4 + $0x8] ss:$0 sps:$4 sm:$0x11]  }
 0x1a7   :  { %v3308_v41 = vpop.f32.mrb[20].mxu0 }
 0x1a8   :  { %v3309_v22 = vpop.f32.mrb[21].mxu0 }
 0x1a9   :  { %v3310_v23 = vadd.f32 %v3309_v22, %v3308_v41  ;;  %v3311_v32 = vpop.f32.mrb[22].mxu0  ;;  %v3330_v34 = vpop.f32.mrb[16].mxu1 }
 0x1aa   :  { %v3312_v13 = vpop.f32.mrb[23].mxu0  ;;  %v3331_v26 = vpop.f32.mrb[17].mxu1 }
 0x1ab   :  { %v2166_v24 = vadd.f32 %v3310_v23, %v3288_v10  ;;  %v3313_v25 = vadd.f32 %v3312_v13, %v3311_v32  ;;  %v3332_v28 = vadd.f32 %v3331_v26, %v3330_v34  ;;  %v3333_v60 = vpop.f32.mrb[18].mxu1 }
 0x1ac   :  { %v3334_v8 = vpop.f32.mrb[19].mxu1 }
 0x1ad   :  { %v2169_v7 = vadd.f32 %v3313_v25, %v3291_v20  ;;  %v3335_v11 = vadd.f32 %v3334_v8, %v3333_v60  ;;  %v2207_v30 = vadd.f32 %v3332_v28, %v2166_v24 }
 0x1af   :  { %v2210_v6 = vadd.f32 %v3335_v11, %v2169_v7 }
 0x1d7   :  { %v2247_v52 = vpop.f32.mrb[24].mxu0 }
 0x1d8   :  { %v2248_v40 = vadd.f32 %v2247_v52, %v2207_v30  ;;  %v2249_v62 = vpop.f32.mrb[25].mxu0 }
 0x1d9   :  { %v2250_v51 = vpop.f32.mrb[26].mxu0 }
 0x1da   :  { %v2254_v38 = vadd.f32 %v2248_v40, %v1569_v17  ;;  %v2251_v39 = vadd.f32 %v2250_v51, %v2210_v6  ;;  %v2252_v45 = vpop.f32.mrb[27].mxu0 }
 0x1dc   :  { %v2263_v47 = vadd.f32 %v3069_v49, %v2254_v38  ;;  %v2255_v58 = vadd.f32 %v2251_v39, %v1572_v31 }
 0x1de   :  { %v2264_v48 = vadd.f32 %v3069_v49, %v2255_v58  ;;  %v2265_v53 = vmax.f32 %v2263_v47, 0.0 }
 0x1e0   :  { %v2266_v42 = vmax.f32 %v2264_v48, 0.0 }
 0x1e2   :  { %v2267_v18 = vpack.c.bf16 %v2266_v42, %v2265_v53 }
 0x1e4   :  { %2461 = vmatmul.mubr.bf16.vlgmr.msra.gmra.mrb[20].mxu1 %v2267_v18 }
 0x1e5   :  { %3352 = vmatpush3.bf16.msra.mxu1 %v3595_v43  ;;  %3367 = vmatprep.mubr.msk.bf16.mxu1 %vm3636_vm7, %v3635_v46 }
 0x1e6   :  { %3353 = vmatprep.subr.bf16.mxu1 %v3635_v46 }
 0x1e9   :  { %3354 = vmatpush3.bf16.msra.mxu1 %v3596_v54 }
 0x1ea   :  { %3355 = vmatprep.subr.bf16.mxu1 %v3635_v46 }
 0x1ed   :  { %3356 = vmatpush3.bf16.msra.mxu1 %v3597_v55 }
 0x1ee   :  { %3357 = vmatprep.subr.bf16.mxu1 %v3635_v46 }
 0x1f1   :  { %3358 = vmatpush3.bf16.msra.mxu1 %v3598_v56 }
 0x1f2   :  { %3359 = vmatprep.subr.bf16.mxu1 %v3635_v46 }
 0x1f5   :  { %3360 = vmatpush3.bf16.msra.mxu1 %v3599_v57 }
 0x1f6   :  { %3361 = vmatprep.subr.bf16.mxu1 %v3635_v46 }
 0x1f9   :  { %3362 = vmatpush3.bf16.msra.mxu1 %v3600_v59 }
 0x1fa   :  { %3363 = vmatprep.subr.bf16.mxu1 %v3635_v46 }
 0x1fd   :  { %3364 = vmatpush3.bf16.msra.mxu1 %v3601_v37 }
 0x1fe   :  { %3365 = vmatprep.subr.bf16.mxu1 %v3635_v46  ;;  %v3603_v46 = vld [vmem:[%s4123_s4] sm:$0xff]  }
 0x201   :  { %3366 = vmatpush3.bf16.msra.mxu1 %v3602_v35 }
 0x204   :  { %3368 = vmatmul.mubr.bf16.vlgmr.msra.gmra.mrb[24].mxu1 %v2267_v18 }
 0x205   :  { %2742 = vmatprep.mubr.bf16.mxu1 %v3634_v44 }
 0x2b7   :  { %v2462_v4 = vpop.f32.mrb[20].mxu1 }
 0x2b8   :  { %v2512_v9 = vpack.c.bf16 %v2462_v4, %v2462_v4  ;;  %v2464_v27 = vpop.f32.mrb[21].mxu1 }
 0x2b9   :  { %v2513_v29 = vpack.c.bf16 %v2464_v27, %v2464_v27  ;;  %v2466_v61 = vpop.f32.mrb[22].mxu1 }
 0x2ba   :  { %v2535_v63 = vsel %vm2533_vm8, %v2512_v9, 0  ;;  %v2681_v33 = vpack.c.bf16 %v2466_v61, %v2466_v61  ;;  %v2468_v50 = vpop.f32.mrb[23].mxu1 }
 0x2bb   :  { %v2682_v0 = vpack.c.bf16 %v2468_v50, %v2468_v50  ;;  %3096 = vmatprep.subr.msk.bf16.mxu0 %vm2533_vm8, %v2513_v29 }
 0x2bc   :  { %v2702_v1 = vsel %vm2533_vm8, %v2681_v33, 0  ;;  %2544 = vmatpush1.bf16.msra.mxu0 %v2535_v63 }
 0x2bd   :  { %3109 = vmatprep.subr.msk.bf16.mxu1 %vm2533_vm8, %v2682_v0 }
 0x2be   :  { %2711 = vmatpush1.bf16.msra.mxu1 %v2702_v1 }
 0x2bf   :  { %3097 = vmatmul.mubr.msk.bf16.vlgmr.msra.gmra.mrb[28].mxu0 %vm2526_vm9, %v3603_v46 }
 0x2c0   :  { %2585 = vmatprep.mubr.bf16.mxu0 %v3634_v44 }
 0x2c1   :  { %3110 = vmatmul.mubr.msk.bf16.vlgmr.msra.gmra.mrb[28].mxu1 %vm2526_vm9, %v3605_v2 }
 0x2c2   :  { %2752 = vmatprep.mubr.bf16.mxu1 %v3634_v44 }
 0x2c7   :  { %3098 = vmatmul.mubr.msk.bf16.gmra.mrb[32].mxu0 %vm2526_vm9, %v3604_v12 }
 0x2c8   :  { %3373 = vmatprep.mubr.msk.bf16.mxu0 %vm2526_vm9, %v3603_v46 }
 0x2c9   :  { %3111 = vmatmul.mubr.msk.bf16.gmra.mrb[32].mxu1 %vm2526_vm9, %v3606_v3 }
 0x2d7   :  { %v2505_v5 = vpop.f32.mrb[24].mxu1 }
 0x2d8   :  { %v2514_v10 = vpack.c.bf16 %v2505_v5, %v2505_v5  ;;  %v3369_v14 = vpop.f32.mrb[25].mxu1 }
 0x2d9   :  { %v2508_v15 = vpop.f32.mrb[26].mxu1 }
 0x2da   :  { %v2541_v44 = vsel %vm2533_vm8, %v2514_v10, 0  ;;  %v2683_v16 = vpack.c.bf16 %v2508_v15, %v2508_v15  ;;  %v3370_v17 = vpop.f32.mrb[27].mxu1  ;;  %3383 = vmatprep.subr.msk.bf16.mxu0 %vm2533_vm8, %v2514_v10 }
 0x2db   :  { %3372 = vmatpush3.bf16.msra.mxu0 %v2541_v44 }
 0x2dc   :  { %3384 = vmatprep.subr.msk.bf16.mxu0 %vm2533_vm8, %v2683_v16  ;;  %v2708_v19 = vsel %vm2533_vm8, %v2683_v16, 0 }
 0x2de   :  { %3374 = vmatmul.mubr.msk.bf16.vlgmr.msra.gmra.mrb[36].mxu0 %vm2526_vm9, %v3604_v12 }
 0x2df   :  { %3378 = vmatpush3.bf16.msra.mxu0 %v2708_v19  ;;  %3379 = vmatprep.mubr.msk.bf16.mxu0 %vm2526_vm9, %v3605_v2 }
 0x2e6   :  { %3380 = vmatmul.mubr.msk.bf16.vlgmr.msra.gmra.mrb[40].mxu0 %vm2526_vm9, %v3606_v3 }
 0x392   :  { %v2577_v20 = vpop.f32.mrb[28].mxu0 }
 0x393   :  { %v2579_v21 = vpop.f32.mrb[29].mxu0 }
 0x394   :  { %v3126_v31 = vpack.c.bf16 %v2579_v21, %v2577_v20  ;;  %v2581_v36 = vpop.f32.mrb[30].mxu0  ;;  %v2744_v41 = vpop.f32.mrb[28].mxu1 }
 0x395   :  { %v2583_v22 = vpop.f32.mrb[31].mxu0  ;;  %v2746_v23 = vpop.f32.mrb[29].mxu1 }
 0x396   :  { %2675 = vst [vmem:[%s4124_s5] sm:$0xff] %v3126_v31  ;;  %v3128_v32 = vpack.c.bf16 %v2583_v22, %v2581_v36  ;;  %v3132_v34 = vpack.c.bf16 %v2746_v23, %v2744_v41  ;;  %v2748_v13 = vpop.f32.mrb[30].mxu1 }
 0x397   :  { %v2750_v24 = vpop.f32.mrb[31].mxu1 }
 0x398   :  { %2677 = vst [vmem:[%s4124_s5 + $0xc] sm:$0xff] %v3128_v32  ;;  %3120 = vst [vmem:[%s4124_s5 + $0x24] sm:$0xff] %v3132_v34  ;;  %v3134_v25 = vpack.c.bf16 %v2750_v24, %v2748_v13 }
 0x39a   :  { %v2587_v26 = vpop.f32.mrb[32].mxu0  ;;  %3122 = vst [vmem:[%s4124_s5 + $0x30] sm:$0xff] %v3134_v25 }
 0x39b   :  { %v2589_v28 = vpop.f32.mrb[33].mxu0 }
 0x39c   :  { %v3130_v60 = vpack.c.bf16 %v2589_v28, %v2587_v26  ;;  %v2591_v7 = vpop.f32.mrb[34].mxu0  ;;  %v2754_v8 = vpop.f32.mrb[32].mxu1 }
 0x39d   :  { %v2592_v11 = vpop.f32.mrb[35].mxu0  ;;  %v2756_v30 = vpop.f32.mrb[33].mxu1 }
 0x39e   :  { %2679 = vst [vmem:[%s4124_s5 + $0x18] sm:$0x11] %v3130_v60  ;;  %v3136_v6 = vpack.c.bf16 %v2756_v30, %v2754_v8  ;;  %v2758_v52 = vpop.f32.mrb[34].mxu1 }
 0x39f   :  { %v2759_v40 = vpop.f32.mrb[35].mxu1 }
 0x3a0   :  { %3124 = vst [vmem:[%s4124_s5 + $0x3c] sm:$0x11] %v3136_v6 }
 0x3b1   :  { %v3375_v62 = vpop.f32.mrb[36].mxu0 }
 0x3b2   :  { %v3131_v49 = vpack.c.bf16 %v3375_v62, %v3375_v62  ;;  %v2628_v51 = vpop.f32.mrb[37].mxu0 }
 0x3b3   :  { %v3127_v38 = vpack.c.bf16 %v2628_v51, %v2628_v51  ;;  %v3376_v39 = vpop.f32.mrb[38].mxu0 }
 0x3b4   :  { %2680 = vst [vmem:[%s4124_s5 + $0x20] sm:$0x1] %v3131_v49  ;;  %v2631_v45 = vpop.f32.mrb[39].mxu0 }
 0x3b5   :  { %2676 = vst [vmem:[%s4124_s5 + $0x8] sm:$0xf] %v3127_v38  ;;  %v3129_v47 = vpack.c.bf16 %v2631_v45, %v2631_v45 }
 0x3b7   :  { %2678 = vst [vmem:[%s4124_s5 + $0x14] sm:$0xf] %v3129_v47 }
 0x3b9   :  { %v3381_v58 = vpop.f32.mrb[40].mxu0 }
 0x3ba   :  { %v3137_v48 = vpack.c.bf16 %v3381_v58, %v3381_v58  ;;  %v2795_v53 = vpop.f32.mrb[41].mxu0 }
 0x3bb   :  { %v3133_v42 = vpack.c.bf16 %v2795_v53, %v2795_v53  ;;  %v3382_v43 = vpop.f32.mrb[42].mxu0 }
 0x3bc   :  { %3125 = vst [vmem:[%s4124_s5 + $0x44] sm:$0x1] %v3137_v48  ;;  %v2798_v18 = vpop.f32.mrb[43].mxu0 }
 0x3bd   :  { %3121 = vst [vmem:[%s4124_s5 + $0x2c] sm:$0xf] %v3133_v42  ;;  %v3135_v54 = vpack.c.bf16 %v2798_v18, %v2798_v18 }
 0x3bf   :  { %3123 = vst [vmem:[%s4124_s5 + $0x38] sm:$0xf] %v3135_v54 }
 0x3c0   :  { %2853 = vsyncpa [#allocation3], 1 }

</bundles_post_ra>
